<compile_context>
chip_gen: v5e
topology: v5e:2x2
jax: 0.10.0
libtpu: 0.0.40
codegen_flags: <defaults>
</compile_context>

<pallas_src>
import functools
import math

import jax
import jax.numpy as jnp
from jax import lax
from jax.experimental import pallas as pl
from jax.experimental.pallas import tpu as pltpu


def _attn_kernel(x_ref, w_ref, bits_ref, o_ref, *,
                 p_dim, keep_threshold_i32, inv_keep):
    """One grid step = a block of B heads.

    x_ref:    (B, S, E)   activations
    w_ref:    (B, E, 3P)  fused [Wq * 1/sqrt(E) | Wk | Wv]
    bits_ref: (B, S, S)   int32 uniform random bits for dropout
    o_ref:    (B, P, S)   output (lane-dense along S)
    """
    n_heads_blk = x_ref.shape[0]
    # Static unroll over heads in this block: keeps every op 2-D (most robust
    # Mosaic lowering) while amortizing the per-grid-step pipeline overhead.
    for b in range(n_heads_blk):
        x = x_ref[b]          # (S, E)
        w = w_ref[b]          # (E, 3P)

        # Fused QKV projection: x through the MXU once.  The 1/sqrt(E) score
        # scale is already folded into the Wq columns (done in the wrapper).
        qkv = jnp.dot(x, w, preferred_element_type=jnp.float32)   # (S, 3P)
        q = qkv[:, 0:p_dim]
        k = qkv[:, p_dim:2 * p_dim]
        v = qkv[:, 2 * p_dim:3 * p_dim]

        # Scaled scores (S, S): contract the P dim (transposed-RHS form is
        # MXU-native, no explicit k.T materialization).
        s = lax.dot_general(q, k, (((1,), (1,)), ((), ())),
                            preferred_element_type=jnp.float32)

        # Numerically-stable softmax numerator; normalization is deferred to
        # the small (S, P) output, so no S x S multiply is spent on it.
        m = jnp.max(s, axis=-1, keepdims=True)
        e = jnp.exp(s - m)                                   # (S, S)  EUP
        denom = jnp.sum(e, axis=-1, keepdims=True)           # (S, 1)

        # Dropout in the integer domain: keep iff bits >= threshold.
        keep = bits_ref[b] >= keep_threshold_i32
        e_kept = jnp.where(keep, e, 0.0)

        # Weighted values (S, P).
        out = jnp.dot(e_kept, v, preferred_element_type=jnp.float32)

        # Per-query softmax normalization and dropout rescale, applied to the
        # tiny (S, P) result (they commute with the @V matmul).
        out = out * (inv_keep / denom)

        # Final transpose(-1, -2): only the small (S, P) tile is relayouted;
        # the (P, S) store stays unmasked / lane-dense along S.
        o_ref[b] = out.T.astype(o_ref.dtype)


def model_forward(x1, w_query, w_key, w_value, dropout_p, *,
                  rng_key=None, heads_per_block=2):
    """x1: (H, S, E); w_*: (H, E, P). Returns (H, P, S) float32."""
    H, S, E = x1.shape
    P = w_query.shape[-1]

    dropout_p = float(dropout_p)
    if not 0.0 <= dropout_p < 1.0:
        raise ValueError("dropout_p must be in [0, 1); p == 1 divides by zero")
    inv_scale = 1.0 / math.sqrt(float(E))   # matches qk.div(sqrt(input_shape[0]))
    inv_keep = 1.0 / (1.0 - dropout_p)

    # keep  <=>  u32_bits >= round(p * 2^32), expressed on int32-bitcast bits
    # (a bitcast of uniform uint32 is uniform over the full signed range).
    keep_threshold_i32 = int(round(dropout_p * 2.0 ** 32)) - 2 ** 31
    keep_threshold_i32 = max(-2 ** 31, min(2 ** 31 - 1, keep_threshold_i32))

    # Fuse the three projections into one (H, E, 3P) weight and fold the
    # 1/sqrt(E) scale into the Wq columns (free, done once at trace time).
    w_all = jnp.concatenate(
        [w_query.astype(jnp.float32) * inv_scale,
         w_key.astype(jnp.float32),
         w_value.astype(jnp.float32)], axis=-1)

    # Dropout randomness generated outside the kernel (the stateful TPU PRNG
    # primitives have no interpret/CPU lowering); seed is independent of the
    # grid structure, so re-tiling does not change which elements are dropped.
    if rng_key is None:
        rng_key = jax.random.PRNGKey(0)
    bits = lax.bitcast_convert_type(
        jax.random.bits(rng_key, (H, S, S), dtype=jnp.uint32), jnp.int32)

    B = heads_per_block if (heads_per_block > 0 and H % heads_per_block == 0) else 1

    kernel = functools.partial(
        _attn_kernel,
        p_dim=int(P),
        keep_threshold_i32=keep_threshold_i32,
        inv_keep=inv_keep,
    )

    cost = pl.CostEstimate(
        flops=2 * H * S * (E * 3 * P + 2 * S * P),
        transcendentals=H * S * S,
        bytes_accessed=4 * (H * S * E + H * E * 3 * P + H * S * S + H * P * S),
    )

    return pl.pallas_call(
        kernel,
        out_shape=jax.ShapeDtypeStruct((H, P, S), jnp.float32),
        grid_spec=pltpu.PrefetchScalarGridSpec(
            num_scalar_prefetch=0,
            grid=(H // B,),
            in_specs=[
                pl.BlockSpec((B, S, E), lambda h: (h, 0, 0)),
                pl.BlockSpec((B, E, 3 * P), lambda h: (h, 0, 0)),
                pl.BlockSpec((B, S, S), lambda h: (h, 0, 0)),
            ],
            out_specs=pl.BlockSpec((B, P, S), lambda h: (h, 0, 0)),
        ),
        compiler_params=pltpu.CompilerParams(
            # Heads are independent -> shard the grid across v7x's 2 TCs.
            dimension_semantics=("parallel",),
            vmem_limit_bytes=32 * 1024 * 1024,
        ),
        cost_estimate=cost,
    )(x1.astype(jnp.float32), w_all, bits)


if __name__ == "__main__":
    # Small shapes consistent with the module (original: H=8, S=512, E=128, P=3)
    H, S, E, P = 4, 128, 32, 3
    dropout_p = 0.1

    key = jax.random.PRNGKey(0)
    kx, kq, kk, kv, kd = jax.random.split(key, 5)
    x1 = jax.random.normal(kx, (H, S, E), dtype=jnp.float32)
    w_query = jax.random.normal(kq, (H, E, P), dtype=jnp.float32)
    w_key = jax.random.normal(kk, (H, E, P), dtype=jnp.float32)
    w_value = jax.random.normal(kv, (H, E, P), dtype=jnp.float32)

    out = model_forward(x1, w_query, w_key, w_value, dropout_p,
                        rng_key=kd, heads_per_block=2)
    out = jax.block_until_ready(out)

    assert out.shape == (H, P, S), out.shape
    assert bool(jnp.all(jnp.isfinite(out)))
    print("KERNEL_OK")
</pallas_src>

<mosaic_0001>
module attributes {stable_mosaic.version = 11 : i64} {
  func.func @_attn_kernel(%arg0: i32, %arg1: memref<2x128x32xf32, #tpu.memory_space<vmem>>, %arg2: memref<2x32x9xf32, #tpu.memory_space<vmem>>, %arg3: memref<2x128x128xi32, #tpu.memory_space<vmem>>, %arg4: memref<2x3x128xf32, #tpu.memory_space<vmem>>) attributes {dimension_semantics = [#tpu.dimension_semantics<parallel>], iteration_bounds = array<i64: 2>, scalar_prefetch = 0 : i64, scratch_operands = 0 : i64, tpu.core_type = #tpu.core_type<tc>, window_params = [{transform_indices = @transform_0, window_bounds = array<i64: 2, 128, 32>}, {transform_indices = @transform_1, window_bounds = array<i64: 2, 32, 9>}, {transform_indices = @transform_2, window_bounds = array<i64: 2, 128, 128>}, {transform_indices = @transform_3, window_bounds = array<i64: 2, 3, 128>}]} {
    %c0 = arith.constant 0 : index
    %c0_0 = arith.constant 0 : index
    %c0_1 = arith.constant 0 : index
    %0 = vector.load %arg1[%c0, %c0_0, %c0_1] : memref<2x128x32xf32, #tpu.memory_space<vmem>>, vector<1x128x32xf32>
    %1 = vector.shape_cast %0 : vector<1x128x32xf32> to vector<128x32xf32>
    %c0_2 = arith.constant 0 : index
    %c0_3 = arith.constant 0 : index
    %c0_4 = arith.constant 0 : index
    %2 = vector.load %arg2[%c0_2, %c0_3, %c0_4] : memref<2x32x9xf32, #tpu.memory_space<vmem>>, vector<1x32x9xf32>
    %3 = vector.shape_cast %2 : vector<1x32x9xf32> to vector<32x9xf32>
    %cst = arith.constant dense<0.000000e+00> : vector<128x9xf32>
    %4 = tpu.matmul %1, %3, %cst {dimension_numbers = #tpu.dot_dimension_numbers<[1], [0], [0], [1], [0, 0, 1, 1], [], []>} : vector<128x32xf32>, vector<32x9xf32>, vector<128x9xf32> -> vector<128x9xf32>
    %5 = vector.extract_strided_slice %4 {offsets = [0, 0], sizes = [128, 3], strides = [1, 1]} : vector<128x9xf32> to vector<128x3xf32>
    %6 = vector.extract_strided_slice %4 {offsets = [0, 3], sizes = [128, 3], strides = [1, 1]} : vector<128x9xf32> to vector<128x3xf32>
    %7 = vector.extract_strided_slice %4 {offsets = [0, 6], sizes = [128, 3], strides = [1, 1]} : vector<128x9xf32> to vector<128x3xf32>
    %cst_5 = arith.constant dense<0.000000e+00> : vector<128x128xf32>
    %8 = tpu.matmul %5, %6, %cst_5 {dimension_numbers = #tpu.dot_dimension_numbers<[1], [1], [0], [0], [0, 0, 1, 0], [], []>} : vector<128x3xf32>, vector<128x3xf32>, vector<128x128xf32> -> vector<128x128xf32>
    %cst_6 = arith.constant dense<0xFF800000> : vector<128xf32>
    %9 = vector.multi_reduction <maximumf>, %8, %cst_6 [1] : vector<128x128xf32> to vector<128xf32>
    %10 = vector.shape_cast %9 : vector<128xf32> to vector<128x1xf32>
    %11 = vector.broadcast %10 : vector<128x1xf32> to vector<128x128xf32>
    %12 = arith.subf %8, %11 : vector<128x128xf32>
    %13 = math.exp %12 : vector<128x128xf32>
    %cst_7 = arith.constant dense<0.000000e+00> : vector<128xf32>
    %14 = vector.multi_reduction <add>, %13, %cst_7 [1] : vector<128x128xf32> to vector<128xf32>
    %15 = vector.shape_cast %14 : vector<128xf32> to vector<128x1xf32>
    %c0_8 = arith.constant 0 : index
    %c0_9 = arith.constant 0 : index
    %c0_10 = arith.constant 0 : index
    %16 = vector.load %arg3[%c0_8, %c0_9, %c0_10] : memref<2x128x128xi32, #tpu.memory_space<vmem>>, vector<1x128x128xi32>
    %17 = vector.shape_cast %16 : vector<1x128x128xi32> to vector<128x128xi32>
    %c-1717986918_i32 = arith.constant -1717986918 : i32
    %18 = vector.broadcast %c-1717986918_i32 : i32 to vector<128x128xi32>
    %19 = arith.cmpi sge, %17, %18 : vector<128x128xi32>
    %cst_11 = arith.constant 0.000000e+00 : f32
    %20 = vector.broadcast %cst_11 : f32 to vector<128x128xf32>
    %21 = arith.select %19, %13, %20 : vector<128x128xi1>, vector<128x128xf32>
    %cst_12 = arith.constant dense<0.000000e+00> : vector<128x3xf32>
    %22 = tpu.matmul %21, %7, %cst_12 {dimension_numbers = #tpu.dot_dimension_numbers<[1], [0], [0], [1], [0, 0, 1, 1], [], []>} : vector<128x128xf32>, vector<128x3xf32>, vector<128x3xf32> -> vector<128x3xf32>
    %cst_13 = arith.constant 1.11111116 : f32
    %23 = vector.broadcast %cst_13 : f32 to vector<128x1xf32>
    %24 = arith.divf %23, %15 : vector<128x1xf32>
    %25 = vector.broadcast %24 : vector<128x1xf32> to vector<128x3xf32>
    %26 = arith.mulf %22, %25 : vector<128x3xf32>
    %27 = tpu.transpose %26, [1, 0] : vector<128x3xf32> -> vector<3x128xf32>
    %c0_14 = arith.constant 0 : index
    %c0_15 = arith.constant 0 : index
    %c0_16 = arith.constant 0 : index
    %28 = vector.load %arg4[%c0_14, %c0_15, %c0_16] : memref<2x3x128xf32, #tpu.memory_space<vmem>>, vector<1x3x128xf32>
    %29 = vector.shape_cast %28 : vector<1x3x128xf32> to vector<3x128xf32>
    %30 = vector.shape_cast %27 : vector<3x128xf32> to vector<1x3x128xf32>
    tpu.vector_store %arg4[%c0_14, %c0_15, %c0_16], %30 {strides = array<i32>} : memref<2x3x128xf32, #tpu.memory_space<vmem>>, vector<1x3x128xf32>,
    %c1 = arith.constant 1 : index
    %c0_17 = arith.constant 0 : index
    %c0_18 = arith.constant 0 : index
    %31 = vector.load %arg1[%c1, %c0_17, %c0_18] : memref<2x128x32xf32, #tpu.memory_space<vmem>>, vector<1x128x32xf32>
    %32 = vector.shape_cast %31 : vector<1x128x32xf32> to vector<128x32xf32>
    %c1_19 = arith.constant 1 : index
    %c0_20 = arith.constant 0 : index
    %c0_21 = arith.constant 0 : index
    %33 = vector.load %arg2[%c1_19, %c0_20, %c0_21] : memref<2x32x9xf32, #tpu.memory_space<vmem>>, vector<1x32x9xf32>
    %34 = vector.shape_cast %33 : vector<1x32x9xf32> to vector<32x9xf32>
    %cst_22 = arith.constant dense<0.000000e+00> : vector<128x9xf32>
    %35 = tpu.matmul %32, %34, %cst_22 {dimension_numbers = #tpu.dot_dimension_numbers<[1], [0], [0], [1], [0, 0, 1, 1], [], []>} : vector<128x32xf32>, vector<32x9xf32>, vector<128x9xf32> -> vector<128x9xf32>
    %36 = vector.extract_strided_slice %35 {offsets = [0, 0], sizes = [128, 3], strides = [1, 1]} : vector<128x9xf32> to vector<128x3xf32>
    %37 = vector.extract_strided_slice %35 {offsets = [0, 3], sizes = [128, 3], strides = [1, 1]} : vector<128x9xf32> to vector<128x3xf32>
    %38 = vector.extract_strided_slice %35 {offsets = [0, 6], sizes = [128, 3], strides = [1, 1]} : vector<128x9xf32> to vector<128x3xf32>
    %cst_23 = arith.constant dense<0.000000e+00> : vector<128x128xf32>
    %39 = tpu.matmul %36, %37, %cst_23 {dimension_numbers = #tpu.dot_dimension_numbers<[1], [1], [0], [0], [0, 0, 1, 0], [], []>} : vector<128x3xf32>, vector<128x3xf32>, vector<128x128xf32> -> vector<128x128xf32>
    %cst_24 = arith.constant dense<0xFF800000> : vector<128xf32>
    %40 = vector.multi_reduction <maximumf>, %39, %cst_24 [1] : vector<128x128xf32> to vector<128xf32>
    %41 = vector.shape_cast %40 : vector<128xf32> to vector<128x1xf32>
    %42 = vector.broadcast %41 : vector<128x1xf32> to vector<128x128xf32>
    %43 = arith.subf %39, %42 : vector<128x128xf32>
    %44 = math.exp %43 : vector<128x128xf32>
    %cst_25 = arith.constant dense<0.000000e+00> : vector<128xf32>
    %45 = vector.multi_reduction <add>, %44, %cst_25 [1] : vector<128x128xf32> to vector<128xf32>
    %46 = vector.shape_cast %45 : vector<128xf32> to vector<128x1xf32>
    %c1_26 = arith.constant 1 : index
    %c0_27 = arith.constant 0 : index
    %c0_28 = arith.constant 0 : index
    %47 = vector.load %arg3[%c1_26, %c0_27, %c0_28] : memref<2x128x128xi32, #tpu.memory_space<vmem>>, vector<1x128x128xi32>
    %48 = vector.shape_cast %47 : vector<1x128x128xi32> to vector<128x128xi32>
    %c-1717986918_i32_29 = arith.constant -1717986918 : i32
    %49 = vector.broadcast %c-1717986918_i32_29 : i32 to vector<128x128xi32>
    %50 = arith.cmpi sge, %48, %49 : vector<128x128xi32>
    %cst_30 = arith.constant 0.000000e+00 : f32
    %51 = vector.broadcast %cst_30 : f32 to vector<128x128xf32>
    %52 = arith.select %50, %44, %51 : vector<128x128xi1>, vector<128x128xf32>
    %cst_31 = arith.constant dense<0.000000e+00> : vector<128x3xf32>
    %53 = tpu.matmul %52, %38, %cst_31 {dimension_numbers = #tpu.dot_dimension_numbers<[1], [0], [0], [1], [0, 0, 1, 1], [], []>} : vector<128x128xf32>, vector<128x3xf32>, vector<128x3xf32> -> vector<128x3xf32>
    %cst_32 = arith.constant 1.11111116 : f32
    %54 = vector.broadcast %cst_32 : f32 to vector<128x1xf32>
    %55 = arith.divf %54, %46 : vector<128x1xf32>
    %56 = vector.broadcast %55 : vector<128x1xf32> to vector<128x3xf32>
    %57 = arith.mulf %53, %56 : vector<128x3xf32>
    %58 = tpu.transpose %57, [1, 0] : vector<128x3xf32> -> vector<3x128xf32>
    %c1_33 = arith.constant 1 : index
    %c0_34 = arith.constant 0 : index
    %c0_35 = arith.constant 0 : index
    %59 = vector.load %arg4[%c1_33, %c0_34, %c0_35] : memref<2x3x128xf32, #tpu.memory_space<vmem>>, vector<1x3x128xf32>
    %60 = vector.shape_cast %59 : vector<1x3x128xf32> to vector<3x128xf32>
    %61 = vector.shape_cast %58 : vector<3x128xf32> to vector<1x3x128xf32>
    tpu.vector_store %arg4[%c1_33, %c0_34, %c0_35], %61 {strides = array<i32>} : memref<2x3x128xf32, #tpu.memory_space<vmem>>, vector<1x3x128xf32>,
    return
  }
  func.func @transform_0(%arg0: i32) -> (i32, i32, i32) {
    %c0_i32 = arith.constant 0 : i32
    %c0_i32_0 = arith.constant 0 : i32
    %c0_i32_1 = arith.constant 0 : i32
    return %arg0, %c0_i32, %c0_i32_0 : i32, i32, i32
  }
  func.func @transform_1(%arg0: i32) -> (i32, i32, i32) {
    %c0_i32 = arith.constant 0 : i32
    %c0_i32_0 = arith.constant 0 : i32
    %c0_i32_1 = arith.constant 0 : i32
    return %arg0, %c0_i32, %c0_i32_0 : i32, i32, i32
  }
  func.func @transform_2(%arg0: i32) -> (i32, i32, i32) {
    %c0_i32 = arith.constant 0 : i32
    %c0_i32_0 = arith.constant 0 : i32
    %c0_i32_1 = arith.constant 0 : i32
    return %arg0, %c0_i32, %c0_i32_0 : i32, i32, i32
  }
  func.func @transform_3(%arg0: i32) -> (i32, i32, i32) {
    %c0_i32 = arith.constant 0 : i32
    %c0_i32_0 = arith.constant 0 : i32
    %c0_i32_1 = arith.constant 0 : i32
    return %arg0, %c0_i32, %c0_i32_0 : i32, i32, i32
  }
}

</mosaic_0001>

<bundles_post_ra>
// kernel: tpu_custom_call.1
= control target key start
LH: loop header
LB: loop body
LE: loop exit
PB: predicated region body
PF: predicated region fallthrough
CT: control target
= control target key end

     0   :  { %s2499_s12 = smov 0   ;;  %s3482_s0 = inlined_call_operand.vmem [shape: f32[4,128,32], index: 0, kind: input, shape index: {}]   ;;  %s3483_s1 = inlined_call_operand.vmem [shape: f32[4,32,9], index: 1, kind: input, shape index: {}]   ;;  %s3484_s2 = inlined_call_operand.vmem [shape: s32[4,128,128], index: 2, kind: input, shape index: {}]   ;;  %s3485_s3 = inlined_call_operand.vmem [shape: f32[4,3,128], index: 3, kind: output, shape index: {}]  }
   0x1 LB: > { %s2057_s13 = sadd.s32 4294967295, %s2475_s12   ;;  %p2061_p0 = scmp.ge.s32.totalorder %s2475_s12, 1  ;;  %s2475_s12 = sphi %s2499_s12, %s13_s12  }
   0x2   : > { %p163_p1 = scmp.lt.s32.totalorder %s2475_s12, 3 }
   0x4   : > { %p164_p2 = pnand %p2061_p0, %p163_p1 }
   0x5   : > { %s2062_s14 = sshll.u32 (!%p164_p2), %s2057_s13, 1  ;;  %s2477_s23 = smov (!%p164_p2), 125  }
   0x6   : > { %167 = sbr.rel (%p164_p2) target bundleno = 1436 (0x59c), region = 32  ;;  %p201_p3 = scmp.lt.s32.totalorder (!%p164_p2), %s2062_s14, 3 }
   0x7   : > { %s2478_s24 = smov (!%p164_p2), 122  }
   0xb   : > { %s3495_s14 = smov (!%p201_p3, %s2062_s14), 3  ;;  %vm247_vm0 = vcmask 261120   ;;  %vm409_vm1 = vcmask 23552  }
   0xc   : > { %s2241_s15 = sshll.u32 %s3495_s14, 5  ;;  %s2240_s16 = sshll.u32 %s3495_s14, 7 }
   0xd   : > { %s212_s19 = scalar_lea.vmem %s3483_s1, %s2241_s15  ;;  %s2523_s22 = scalar_lea.vmem %s3482_s0, %s2240_s16 }
   0xe   : > { %v246_v0 = vld [vmem:[%s212_s19 + $0x18] sm:$0xff]  ;;  %v245_v2 = vld [vmem:[%s212_s19 + $0x10] sm:$0xff]  ;;  %v244_v4 = vld [vmem:[%s212_s19 + $0x8] sm:$0xff]  ;;  %s2992_s27 = scalar_lea.vmem %s3484_s2, %s2240_s16  ;;  %s2072_s28 = sshll.u32 %s3495_s14, 2 }
   0xf   : > { %v2514_v1 = vld [vmem:[%s212_s19 + $0x38] sm:$0xff]  ;;  %308 = vmatpush.msra.mxu0 %v246_v0  ;;  %2243 = vmatpush.msra.mxu2 %v246_v0  ;;  %v2516_v3 = vld [vmem:[%s212_s19 + $0x30] sm:$0xff]  ;;  %v2526_v5 = vld [vmem:[%s212_s19 + $0x28] sm:$0xff]  ;;  %s3469_s4 = scalar_lea.vmem %s3485_s3, %s2072_s28 }
  0x10   : > { %2247 = vmatpush.msra.mxu3 %v2514_v1  ;;  %v243_v6 = vld [vmem:[%s212_s19] sm:$0xff]  ;;  %v2143_v10 = vld [vmem:[%s2523_s22 + $0xb0] sm:$0xff]  ;;  %v228_v11 = vld [vmem:[%s2523_s22 + $0x8] sm:$0xff] }
  0x11   : > { %309 = vmatpush.msra.mxu0 %v245_v2  ;;  %2244 = vmatpush.msra.mxu2 %v245_v2  ;;  %v2529_v7 = vld [vmem:[%s212_s19 + $0x20] sm:$0xff]  ;;  %v236_v12 = vld [vmem:[%s2523_s22 + $0x48] sm:$0xff]  ;;  %v2144_v13 = vld [vmem:[%s2523_s22 + $0xb8] sm:$0xff] }
  0x12   : > { %2248 = vmatpush.msra.mxu3 %v2516_v3  ;;  %v227_v8 = vld [vmem:[%s2523_s22] sm:$0xff]  ;;  %v229_v14 = vld [vmem:[%s2523_s22 + $0x10] sm:$0xff]  ;;  %v230_v17 = vld [vmem:[%s2523_s22 + $0x18] sm:$0xff] }
  0x13   : > { %310 = vmatpush.msra.mxu0 %v244_v4  ;;  %2245 = vmatpush.msra.mxu2 %v244_v4  ;;  %v235_v9 = vld [vmem:[%s2523_s22 + $0x40] sm:$0xff]  ;;  %v237_v15 = vld [vmem:[%s2523_s22 + $0x50] sm:$0xff]  ;;  %v238_v18 = vld [vmem:[%s2523_s22 + $0x58] sm:$0xff] }
  0x14   : > { %2249 = vmatpush.msra.mxu3 %v2526_v5  ;;  %v2145_v16 = vld [vmem:[%s2523_s22 + $0xc0] sm:$0xff]  ;;  %v2146_v19 = vld [vmem:[%s2523_s22 + $0xc8] sm:$0xff]  ;;  %v2147_v22 = vld [vmem:[%s2523_s22 + $0xd0] sm:$0xff] }
  0x15   : > { %311 = vmatpush.msra.mxu0 %v243_v6  ;;  %2246 = vmatpush.msra.mxu2 %v243_v6  ;;  %v231_v20 = vld [vmem:[%s2523_s22 + $0x20] sm:$0xff]  ;;  %v232_v23 = vld [vmem:[%s2523_s22 + $0x28] sm:$0xff]  ;;  %v2148_v25 = vld [vmem:[%s2523_s22 + $0xd8] sm:$0xff] }
  0x16   : > { %2250 = vmatpush.msra.mxu3 %v2529_v7  ;;  %2073 = vmatmul.msk.f32.vlgmr.msra.gmra.mxu0 %vm247_vm0, %v227_v8  ;;  %v239_v21 = vld [vmem:[%s2523_s22 + $0x60] sm:$0xff]  ;;  %v240_v24 = vld [vmem:[%s2523_s22 + $0x68] sm:$0xff]  ;;  %v233_v26 = vld [vmem:[%s2523_s22 + $0x30] sm:$0xff] }
  0x17   : > { %2081 = vmatmul.msk.f32.vlgmr.msra.gmra.mxu2 %vm247_vm0, %v235_v9  ;;  %2163 = vmatmul.msk.f32.vlgmr.msra.gmra.mxu3 %vm247_vm0, %v2143_v10  ;;  %v241_v27 = vld [vmem:[%s2523_s22 + $0x70] sm:$0xff]  ;;  %v2149_v28 = vld [vmem:[%s2523_s22 + $0xe0] sm:$0xff]  ;;  %v234_v29 = vld [vmem:[%s2523_s22 + $0x38] sm:$0xff] }
  0x18   : > { %v242_v30 = vld [vmem:[%s2523_s22 + $0x78] sm:$0xff]  ;;  %v2150_v31 = vld [vmem:[%s2523_s22 + $0xe8] sm:$0xff]  ;;  %v2151_v32 = vld [vmem:[%s2523_s22 + $0xf0] sm:$0xff] }
  0x19   : > { %v2152_v33 = vld [vmem:[%s2523_s22 + $0xf8] sm:$0xff] }
  0x1e   : > { %2074 = vmatmul.msk.f32.gmra.mxu0 %vm247_vm0, %v228_v11 }
  0x1f   : > { %2082 = vmatmul.msk.f32.gmra.mxu2 %vm247_vm0, %v236_v12  ;;  %2164 = vmatmul.msk.f32.gmra.mxu3 %vm247_vm0, %v2144_v13 }
  0x26   : > { %2075 = vmatmul.msk.f32.gmra.mxu0 %vm247_vm0, %v229_v14 }
  0x27   : > { %2083 = vmatmul.msk.f32.gmra.mxu2 %vm247_vm0, %v237_v15  ;;  %2165 = vmatmul.msk.f32.gmra.mxu3 %vm247_vm0, %v2145_v16 }
  0x2e   : > { %2076 = vmatmul.msk.f32.gmra.mxu0 %vm247_vm0, %v230_v17  ;;  %v2138_v17 = vld [vmem:[%s2523_s22 + $0x88] sm:$0xff] }
  0x2f   : > { %2084 = vmatmul.msk.f32.gmra.mxu2 %vm247_vm0, %v238_v18  ;;  %2166 = vmatmul.msk.f32.gmra.mxu3 %vm247_vm0, %v2146_v19 }
  0x36   : > { %2077 = vmatmul.msk.f32.gmra.mxu0 %vm247_vm0, %v231_v20 }
  0x37   : > { %2085 = vmatmul.msk.f32.gmra.mxu2 %vm247_vm0, %v239_v21  ;;  %2167 = vmatmul.msk.f32.gmra.mxu3 %vm247_vm0, %v2147_v22  ;;  %v2139_v22 = vld [vmem:[%s2523_s22 + $0x90] sm:$0xff] }
  0x3e   : > { %2078 = vmatmul.msk.f32.gmra.mxu0 %vm247_vm0, %v232_v23 }
  0x3f   : > { %2086 = vmatmul.msk.f32.gmra.mxu2 %vm247_vm0, %v240_v24  ;;  %2168 = vmatmul.msk.f32.gmra.mxu3 %vm247_vm0, %v2148_v25 }
  0x46   : > { %2079 = vmatmul.msk.f32.gmra.mxu0 %vm247_vm0, %v233_v26 }
  0x47   : > { %2087 = vmatmul.msk.f32.gmra.mxu2 %vm247_vm0, %v241_v27  ;;  %2169 = vmatmul.msk.f32.gmra.mxu3 %vm247_vm0, %v2149_v28  ;;  %v2140_v27 = vld [vmem:[%s2523_s22 + $0x98] sm:$0xff] }
  0x4e   : > { %2080 = vmatmul.msk.f32.gmra.mxu0 %vm247_vm0, %v234_v29 }
  0x4f   : > { %2088 = vmatmul.msk.f32.gmra.mxu2 %vm247_vm0, %v242_v30  ;;  %2170 = vmatmul.msk.f32.gmra.mxu3 %vm247_vm0, %v2150_v31 }
  0x57   : > { %2171 = vmatmul.msk.f32.gmra.mxu3 %vm247_vm0, %v2151_v32 }
  0x5f   : > { %2172 = vmatmul.msk.f32.gmra.mxu3 %vm247_vm0, %v2152_v33 }
  0x93   : > { %v2585_v34 = vpop.f32.mrf.mxu0 }
  0x9a   : > { %v2587_v35 = vpop.f32.mrf.mxu2  ;;  %v2593_v38 = vpop.f32.mrf.mxu3 }
  0x9b   : > { %v2589_v36 = vpop.f32.mrf.mxu0 }
  0xa2   : > { %v2591_v37 = vpop.f32.mrf.mxu2  ;;  %v2601_v42 = vpop.f32.mrf.mxu3 }
  0xa3   : > { %v2595_v39 = vpop.f32.mrf.mxu0 }
  0xaa   : > { %v2597_v40 = vpop.f32.mrf.mxu2  ;;  %v2609_v45 = vpop.f32.mrf.mxu3 }
  0xab   : > { %v2599_v41 = vpop.f32.mrf.mxu0 }
  0xb2   : > { %v2603_v43 = vpop.f32.mrf.mxu2  ;;  %v2617_v48 = vpop.f32.mrf.mxu3 }
  0xb3   : > { %399 = vrot.lane.b32.xlu2 %v2603_v43, %s2477_s23  ;;  %v2607_v44 = vpop.f32.mrf.mxu0 }
  0xba   : > { %v2611_v46 = vpop.f32.mrf.mxu2  ;;  %v2627_v52 = vpop.f32.mrf.mxu3 }
  0xbb   : > { %397 = vrot.lane.b32.xlu2 %v2597_v40, %s2477_s23  ;;  %v2615_v47 = vpop.f32.mrf.mxu0 }
  0xc2   : > { %v2619_v49 = vpop.f32.mrf.mxu2  ;;  %v2643_v55 = vpop.f32.mrf.mxu3 }
  0xc3   : > { %403 = vrot.lane.b32.xlu1 %v2619_v49, %s2477_s23  ;;  %v2623_v50 = vpop.f32.mrf.mxu0 }
  0xca   : > { %v2625_v51 = vpop.f32.mrf.mxu2  ;;  %v2651_v56 = vpop.f32.mrf.mxu3 }
  0xcb   : > { %401 = vrot.lane.b32.xlu1 %v2611_v46, %s2477_s23  ;;  %v2631_v53 = vpop.f32.mrf.mxu0 }
  0xcc   : > { %391 = vrot.lane.b32.xlu2 %v2631_v53, %s2477_s23 }
  0xd2   : > { %v2635_v54 = vpop.f32.mrf.mxu2  ;;  %v2659_v57 = vpop.f32.mrf.mxu3 }
  0xd3   : > { %393 = vrot.lane.b32.xlu1 %v2587_v35, %s2477_s23  ;;  %407 = vrot.lane.b32.xlu0 %v2635_v54, %s2477_s23 }
  0xd4   : > { %385 = vrot.lane.b32.xlu2 %v2607_v44, %s2477_s23 }
  0xda   : > { %v2667_v58 = vpop.f32.mrf.mxu3 }
  0xdb   : > { %405 = vrot.lane.b32.xlu0 %v2625_v51, %s2477_s23  ;;  %387 = vrot.lane.b32.xlu1 %v2615_v47, %s2477_s23 }
  0xdc   : > { %379 = vrot.lane.b32.xlu2 %v2589_v36, %s2477_s23 }
  0xe2   : > { %v2679_v59 = vpop.f32.mrf.mxu3 }
  0xe3   : > { %395 = vrot.lane.b32.xlu0 %v2591_v37, %s2477_s23  ;;  %381 = vrot.lane.b32.xlu1 %v2595_v39, %s2477_s23 }
  0xe4   : > { %1274 = vrot.lane.b32.xlu2 %v2643_v55, %s2477_s23 }
  0xeb   : > { %389 = vrot.lane.b32.xlu0 %v2623_v50, %s2477_s23  ;;  %1276 = vrot.lane.b32.xlu1 %v2651_v56, %s2477_s23 }
  0xec   : > { %1268 = vrot.lane.b32.xlu2 %v2609_v45, %s2477_s23 }
  0xf3   : > { %383 = vrot.lane.b32.xlu0 %v2599_v41, %s2477_s23  ;;  %1270 = vrot.lane.b32.xlu1 %v2617_v48, %s2477_s23 }
  0xf4   : > { %1280 = vrot.lane.b32.xlu2 %v2667_v58, %s2477_s23 }
  0xfb   : > { %377 = vrot.lane.b32.xlu0 %v2585_v34, %s2477_s23  ;;  %1264 = vrot.lane.b32.xlu1 %v2593_v38, %s2477_s23 }
 0x103   : > { %1272 = vrot.lane.b32.xlu0 %v2627_v52, %s2477_s23  ;;  %1282 = vrot.lane.b32.xlu1 %v2679_v59, %s2477_s23 }
 0x10b   : > { %1266 = vrot.lane.b32.xlu0 %v2601_v42, %s2477_s23 }
 0x10d   : > { %v400_v63 = vpop.permute.xlu2 %399 }
 0x113   : > { %1278 = vrot.lane.b32.xlu0 %v2659_v57, %s2477_s23 }
 0x115   : > { %v398_v2 = vpop.permute.xlu2 %397 }
 0x126   : > { %v392_v8 = vpop.permute.xlu2 %391 }
 0x12e   : > { %v386_v11 = vpop.permute.xlu2 %385 }
 0x135   : > { %v404_v61 = vpop.permute.xlu1 %403 }
 0x136   : > { %v380_v14 = vpop.permute.xlu2 %379 }
 0x13d   : > { %v402_v0 = vpop.permute.xlu1 %401 }
 0x13e   : > { %v1275_v18 = vpop.permute.xlu2 %1274 }
 0x145   : > { %v408_v60 = vpop.permute.xlu0 %407  ;;  %v394_v6 = vpop.permute.xlu1 %393 }
 0x146   : > { %2089 = vmatpush.xpose.msk.msra.mxu1 %vm409_vm1, %v408_v60  ;;  %v1269_v23 = vpop.permute.xlu2 %1268  ;;  %v2141_v60 = vld [vmem:[%s2523_s22 + $0xa0] sm:$0xff] }
 0x14d   : > { %v406_v62 = vpop.permute.xlu0 %405  ;;  %v388_v10 = vpop.permute.xlu1 %387 }
 0x14e   : > { %2090 = vmatpush.xpose.msk.msra.mxu1 %vm409_vm1, %v406_v62  ;;  %v1281_v28 = vpop.permute.xlu2 %1280  ;;  %v2142_v62 = vld [vmem:[%s2523_s22 + $0xa8] sm:$0xff] }
 0x152   : > { %2091 = vmatpush.xpose.msk.msra.mxu1 %vm409_vm1, %v404_v61 }
 0x155   : > { %v396_v4 = vpop.permute.xlu0 %395  ;;  %v382_v13 = vpop.permute.xlu1 %381 }
 0x156   : > { %2092 = vmatpush.xpose.msk.msra.mxu1 %vm409_vm1, %v402_v0 }
 0x15a   : > { %2093 = vmatpush.xpose.msk.msra.mxu1 %vm409_vm1, %v400_v63 }
 0x15d   : > { %v390_v9 = vpop.permute.xlu0 %389 }
 0x15e   : > { %2094 = vmatpush.xpose.msk.msra.mxu1 %vm409_vm1, %v398_v2 }
 0x162   : > { %2095 = vmatpush.xpose.msk.msra.mxu1 %vm409_vm1, %v396_v4 }
 0x165   : > { %v384_v12 = vpop.permute.xlu0 %383 }
 0x166   : > { %2096 = vmatpush.xpose.msk.msra.mxu1 %vm409_vm1, %v394_v6 }
 0x16a   : > { %2097 = vmatpush.xpose.msk.msra.mxu1 %vm409_vm1, %v392_v8 }
 0x16d   : > { %v378_v15 = vpop.permute.xlu0 %377 }
 0x16e   : > { %2098 = vmatpush.xpose.msk.msra.mxu1 %vm409_vm1, %v390_v9 }
 0x172   : > { %2099 = vmatpush.xpose.msk.msra.mxu1 %vm409_vm1, %v388_v10 }
 0x175   : > { %v1273_v19 = vpop.permute.xlu0 %1272 }
 0x176   : > { %2100 = vmatpush.xpose.msk.msra.mxu1 %vm409_vm1, %v386_v11 }
 0x17a   : > { %2101 = vmatpush.xpose.msk.msra.mxu1 %vm409_vm1, %v384_v12 }
 0x17d   : > { %v1267_v24 = vpop.permute.xlu0 %1266 }
 0x17e   : > { %2102 = vmatpush.xpose.msk.msra.mxu1 %vm409_vm1, %v382_v13 }
 0x182   : > { %2103 = vmatpush.xpose.msk.msra.mxu1 %vm409_vm1, %v380_v14 }
 0x185   : > { %v1279_v29 = vpop.permute.xlu0 %1278 }
 0x186   : > { %2104 = vmatpush.xpose.msk.msra.mxu1 %vm409_vm1, %v378_v15 }
 0x189   : > { %2105 = vmatmul.msk.f32.vlgmr.msra.gmra.mxu1 %vm409_vm1, %v2585_v34 }
 0x18a   : > { %1183 = vmatpush.msrb.mxu1 %v2514_v1  ;;  %v1277_v1 = vpop.permute.xlu1 %1276 }
 0x18c   : > { %1184 = vmatpush.msrb.mxu1 %v2516_v3 }
 0x18e   : > { %1185 = vmatpush.msrb.mxu1 %v2526_v5  ;;  %v2137_v5 = vld [vmem:[%s2523_s22 + $0x80] sm:$0xff] }
 0x190   : > { %1186 = vmatpush.msrb.mxu1 %v2529_v7 }
 0x191   : > { %2106 = vmatmul.msk.f32.gmra.mxu1 %vm409_vm1, %v2589_v36 }
 0x192   : > { %v1271_v7 = vpop.permute.xlu1 %1270 }
 0x199   : > { %2107 = vmatmul.msk.f32.gmra.mxu1 %vm409_vm1, %v2595_v39 }
 0x19a   : > { %v1265_v20 = vpop.permute.xlu1 %1264 }
 0x1a1   : > { %2108 = vmatmul.msk.f32.gmra.mxu1 %vm409_vm1, %v2599_v41 }
 0x1a2   : > { %v1283_v25 = vpop.permute.xlu1 %1282 }
 0x1a3   : > { %2173 = vmatpush.xpose.msk.msrb.mxu0 %vm409_vm1, %v1283_v25 }
 0x1a7   : > { %2174 = vmatpush.xpose.msk.msrb.mxu0 %vm409_vm1, %v1281_v28 }
 0x1a9   : > { %2109 = vmatmul.msk.f32.gmra.mxu1 %vm409_vm1, %v2607_v44 }
 0x1ab   : > { %2175 = vmatpush.xpose.msk.msrb.mxu0 %vm409_vm1, %v1279_v29 }
 0x1af   : > { %2176 = vmatpush.xpose.msk.msrb.mxu0 %vm409_vm1, %v1277_v1 }
 0x1b1   : > { %2110 = vmatmul.msk.f32.gmra.mxu1 %vm409_vm1, %v2615_v47 }
 0x1b3   : > { %2177 = vmatpush.xpose.msk.msrb.mxu0 %vm409_vm1, %v1275_v18 }
 0x1b7   : > { %2178 = vmatpush.xpose.msk.msrb.mxu0 %vm409_vm1, %v1273_v19 }
 0x1b9   : > { %2111 = vmatmul.msk.f32.gmra.mxu1 %vm409_vm1, %v2623_v50 }
 0x1bb   : > { %2179 = vmatpush.xpose.msk.msrb.mxu0 %vm409_vm1, %v1271_v7 }
 0x1bf   : > { %2180 = vmatpush.xpose.msk.msrb.mxu0 %vm409_vm1, %v1269_v23 }
 0x1c1   : > { %2112 = vmatmul.msk.f32.gmra.mxu1 %vm409_vm1, %v2631_v53 }
 0x1c3   : > { %2181 = vmatpush.xpose.msk.msrb.mxu0 %vm409_vm1, %v1267_v24 }
 0x1c7   : > { %2182 = vmatpush.xpose.msk.msrb.mxu0 %vm409_vm1, %v1265_v20 }
 0x1c9   : > { %2113 = vmatmul.msk.f32.gmra.mxu1 %vm409_vm1, %v2587_v35 }
 0x1d1   : > { %2114 = vmatmul.msk.f32.gmra.mxu1 %vm409_vm1, %v2591_v37 }
 0x1d9   : > { %2115 = vmatmul.msk.f32.gmra.mxu1 %vm409_vm1, %v2597_v40 }
 0x1e1   : > { %2116 = vmatmul.msk.f32.gmra.mxu1 %vm409_vm1, %v2603_v43 }
 0x1e9   : > { %2117 = vmatmul.msk.f32.gmra.mxu1 %vm409_vm1, %v2611_v46 }
 0x1f1   : > { %2118 = vmatmul.msk.f32.gmra.mxu1 %vm409_vm1, %v2619_v49 }
 0x1f9   : > { %2119 = vmatmul.msk.f32.gmra.mxu1 %vm409_vm1, %v2625_v51 }
 0x201   : > { %2120 = vmatmul.msk.f32.gmra.mxu1 %vm409_vm1, %v2635_v54 }
 0x206   : > { %v2741_v3 = vpop.f32.mrf.mxu1 }
 0x207   : > { %539 = vmax.xlane.f32.xlu2 %v2741_v3 }
 0x209   : > { %2157 = vmatmul.msk.f32.vlgmr.msrb.gmra.mxu1 %vm247_vm0, %v2137_v5 }
 0x20e   : > { %v494_v16 = vpop.f32.mrf.mxu1 }
 0x20f   : > { %541 = vmax.xlane.f32.xlu0 %v494_v16 }
 0x211   : > { %2158 = vmatmul.msk.f32.gmra.mxu1 %vm247_vm0, %v2138_v17 }
 0x216   : > { %v2748_v21 = vpop.f32.mrf.mxu1 }
 0x217   : > { %543 = vmax.xlane.f32.xlu1 %v2748_v21 }
 0x219   : > { %2159 = vmatmul.msk.f32.gmra.mxu1 %vm247_vm0, %v2139_v22 }
 0x21e   : > { %v2754_v26 = vpop.f32.mrf.mxu1 }
 0x21f   : > { %545 = vmax.xlane.f32.xlu2 %v2754_v26 }
 0x221   : > { %2160 = vmatmul.msk.f32.gmra.mxu1 %vm247_vm0, %v2140_v27 }
 0x226   : > { %v2761_v30 = vpop.f32.mrf.mxu1 }
 0x227   : > { %547 = vmax.xlane.f32.xlu2 %v2761_v30 }
 0x229   : > { %2161 = vmatmul.msk.f32.gmra.mxu1 %vm247_vm0, %v2141_v60 }
 0x22e   : > { %v506_v31 = vpop.f32.mrf.mxu1 }
 0x22f   : > { %549 = vmax.xlane.f32.xlu0 %v506_v31 }
 0x231   : > { %2162 = vmatmul.msk.f32.gmra.mxu1 %vm247_vm0, %v2142_v62 }
 0x236   : > { %v2768_v32 = vpop.f32.mrf.mxu1 }
 0x23e   : > { %v2772_v33 = vpop.f32.mrf.mxu1 }
 0x246   : > { %v2777_v61 = vpop.f32.mrf.mxu1 }
 0x24e   : > { %v2781_v63 = vpop.f32.mrf.mxu1 }
 0x256   : > { %v2783_v0 = vpop.f32.mrf.mxu1 }
 0x25e   : > { %v2785_v2 = vpop.f32.mrf.mxu1 }
 0x266   : > { %v2787_v4 = vpop.f32.mrf.mxu1 }
 0x26e   : > { %v2789_v6 = vpop.f32.mrf.mxu1 }
 0x276   : > { %v2791_v8 = vpop.f32.mrf.mxu1 }
 0x27a   : > { %v540_v1 = vpop.xlane.xlu2 %539 }
 0x27b   : > { %v571_v7 = vsub.f32 %v2741_v3, %v540_v1 }
 0x27d   : > { %v587_v17 = vmul.f32 1.442695, %v571_v7  ;;  %v2281_v7 = vpack.i.bf16 %v2619_v49, %v2667_v58  ;;  %v2276_v49 = vpack.i.bf16 %v2625_v51, %v2679_v59  ;;  %v2301_v51 = vpack.i.bf16 %v2591_v37, %v2627_v52 }
 0x27e   : > { %v2793_v9 = vpop.f32.mrf.mxu1 }
 0x282   : > { %v542_v14 = vpop.xlane.xlu0 %541 }
 0x283   : > { %v572_v15 = vsub.f32 %v494_v16, %v542_v14  ;;  %v2266_v14 = vpack.i.bf16 %v2599_v41, %v2595_v39  ;;  %v2296_v39 = vpack.i.bf16 %v2597_v40, %v2643_v55  ;;  %v2311_v41 = vpack.i.bf16 %v2631_v53, %v2609_v45 }
 0x284   : > { %v2271_v40 = vpack.i.bf16 %v2635_v54, %v2607_v44  ;;  %v2286_v53 = vpack.i.bf16 %v2611_v46, %v2659_v57  ;;  %v2306_v54 = vpack.i.bf16 %v2587_v35, %v2617_v48 }
 0x285   : > { %v589_v5 = vmul.f32 1.442695, %v572_v15 }
 0x286   : > { %v2795_v10 = vpop.f32.mrf.mxu1 }
 0x287   : > { %1252 = vrot.lane.b32.xlu1 %v2795_v10, %s2477_s23  ;;  %2341 = vpow2.f32 %v589_v5 }
 0x288   : > { %2343 = vpow2.f32 %v587_v17 }
 0x28a   : > { %v544_v19 = vpop.xlane.xlu1 %543 }
 0x28b   : > { %v573_v3 = vsub.f32 %v2748_v21, %v544_v19 }
 0x28d   : > { %v2818_v18 = vpop.eup %2341  ;;  %v591_v20 = vmul.f32 1.442695, %v573_v3 }
 0x28e   : > { %v2799_v11 = vpop.f32.mrf.mxu1  ;;  %v2823_v16 = vpop.eup %2343 }
 0x28f   : > { %1254 = vrot.lane.b32.xlu0 %v2799_v11, %s2477_s23  ;;  %2345 = vpow2.f32 %v591_v20 }
 0x292   : > { %v546_v29 = vpop.xlane.xlu2 %545 }
 0x293   : > { %v574_v15 = vsub.f32 %v2754_v26, %v546_v29  ;;  %v2261_v26 = vpack.i.bf16 %v2589_v36, %v2585_v34  ;;  %v2291_v36 = vpack.i.bf16 %v2603_v43, %v2651_v56 }
 0x295   : > { %v2833_v27 = vpop.eup %2345  ;;  %v593_v5 = vmul.f32 1.442695, %v574_v15 }
 0x296   : > { %v2803_v12 = vpop.f32.mrf.mxu1 }
 0x297   : > { %1256 = vrot.lane.b32.xlu2 %v2803_v12, %s2477_s23 }
 0x29e   : > { %v2807_v13 = vpop.f32.mrf.mxu1 }
 0x29f   : > { %1258 = vrot.lane.b32.xlu1 %v2807_v13, %s2477_s23 }
 0x2a2   : > { %v550_v22 = vpop.xlane.xlu0 %549 }
 0x2a3   : > { %v576_v23 = vsub.f32 %v506_v31, %v550_v22  ;;  %v548_v31 = vpop.xlane.xlu2 %547  ;;  %v2316_v22 = vpack.i.bf16 %v2623_v50, %v2601_v42 }
 0x2a4   : > { %v575_v60 = vsub.f32 %v2761_v30, %v548_v31 }
 0x2a5   : > { %v597_v25 = vmul.f32 1.442695, %v576_v23 }
 0x2a6   : > { %v2829_v24 = vpop.f32.mrf.mxu1  ;;  %v595_v62 = vmul.f32 1.442695, %v575_v60 }
 0x2a7   : > { %2347 = vpow2.f32 %v597_v25 }
 0x2a8   : > { %2349 = vpow2.f32 %v595_v62 }
 0x2a9   : > { %2351 = vpow2.f32 %v593_v5 }
 0x2ad   : > { %v2838_v21 = vpop.eup %2347 }
 0x2ae   : > { %v2836_v28 = vpop.f32.mrf.mxu1  ;;  %v2848_v1 = vpop.eup %2349 }
 0x2af   : > { %v2854_v30 = vpop.eup %2351 }
 0x2b9   : > { %555 = vmax.xlane.f32.xlu0 %v2777_v61 }
 0x2c0   : > { %553 = vmax.xlane.f32.xlu2 %v2772_v33 }
 0x2c1   : > { %561 = vmax.xlane.f32.xlu0 %v2785_v2 }
 0x2c8   : > { %559 = vmax.xlane.f32.xlu2 %v2783_v0 }
 0x2c9   : > { %567 = vmax.xlane.f32.xlu0 %v2791_v8  ;;  %551 = vmax.xlane.f32.xlu1 %v2768_v32 }
 0x2d0   : > { %565 = vmax.xlane.f32.xlu2 %v2789_v6 }
 0x2d1   : > { %621 = vadd.xlane.f32.xlu0 %v2818_v18  ;;  %557 = vmax.xlane.f32.xlu1 %v2781_v63 }
 0x2d8   : > { %619 = vadd.xlane.f32.xlu2 %v2823_v16 }
 0x2d9   : > { %563 = vmax.xlane.f32.xlu1 %v2787_v4 }
 0x2e1   : > { %569 = vmax.xlane.f32.xlu1 %v2793_v9 }
 0x2e5   : > { %1260 = vrot.lane.b32.xlu0 %v2829_v24, %s2477_s23 }
 0x2e9   : > { %623 = vadd.xlane.f32.xlu1 %v2833_v27 }
 0x2f0   : > { %1262 = vrot.lane.b32.xlu2 %v2836_v28, %s2477_s23 }
 0x2f1   : > { %629 = vadd.xlane.f32.xlu1 %v2838_v21  ;;  %v1257_v19 = vpop.permute.xlu2 %1256 }
 0x2f9   : > { %v1253_v43 = vpop.permute.xlu1 %1252 }
 0x301   : > { %v1255_v17 = vpop.permute.xlu0 %1254 }
 0x30a   : > { %2267 = vrot.lane.b32.xlu1 %v2266_v14, %s2478_s24 }
 0x30f   : > { %627 = vadd.xlane.f32.xlu0 %v2848_v1 }
 0x311   : > { %v1259_v60 = vpop.permute.xlu1 %1258 }
 0x312   : > { %2282 = vrot.lane.b32.xlu1 %v2281_v7, %s2478_s24 }
 0x319   : > { %625 = vadd.xlane.f32.xlu2 %v2854_v30 }
 0x31a   : > { %2297 = vrot.lane.b32.xlu1 %v2296_v39, %s2478_s24 }
 0x322   : > { %2312 = vrot.lane.b32.xlu1 %v2311_v41, %s2478_s24 }
 0x323   : > { %2262 = vrot.lane.b32.xlu0 %v2261_v26, %s2478_s24 }
 0x32b   : > { %2277 = vrot.lane.b32.xlu0 %v2276_v49, %s2478_s24 }
 0x32c   : > { %v556_v3 = vpop.xlane.xlu0 %555 }
 0x32d   : > { %v579_v46 = vsub.f32 %v2777_v61, %v556_v3  ;;  %v2321_v61 = vpack.i.bf16 %v2615_v47, %v2593_v38 }
 0x32f   : > { %v603_v23 = vmul.f32 1.442695, %v579_v46 }
 0x331   : > { %2272 = vrot.lane.b32.xlu2 %v2271_v40, %s2478_s24  ;;  %2353 = vpow2.f32 %v603_v23 }
 0x333   : > { %2287 = vrot.lane.b32.xlu0 %v2286_v53, %s2478_s24  ;;  %v554_v34 = vpop.xlane.xlu2 %553 }
 0x334   : > { %v562_v20 = vpop.xlane.xlu0 %561 }
 0x335   : > { %v582_v25 = vsub.f32 %v2785_v2, %v562_v20 }
 0x337   : > { %v609_v31 = vmul.f32 1.442695, %v582_v25  ;;  %v2892_v35 = vpop.eup %2353 }
 0x339   : > { %2292 = vrot.lane.b32.xlu2 %v2291_v36, %s2478_s24  ;;  %2355 = vpow2.f32 %v609_v31 }
 0x33b   : > { %2302 = vrot.lane.b32.xlu0 %v2301_v51, %s2478_s24  ;;  %v560_v44 = vpop.xlane.xlu2 %559 }
 0x33c   : > { %v568_v29 = vpop.xlane.xlu0 %567  ;;  %v552_v47 = vpop.xlane.xlu1 %551  ;;  %v581_v40 = vsub.f32 %v2783_v0, %v560_v44 }
 0x33d   : > { %v585_v62 = vsub.f32 %v2791_v8, %v568_v29  ;;  %v578_v8 = vsub.f32 %v2772_v33, %v554_v34  ;;  %v577_v49 = vsub.f32 %v2768_v32, %v552_v47  ;;  %v2326_v29 = vpack.i.bf16 %v2829_v24, %v2836_v28 }
 0x33e   : > { %v607_v3 = vmul.f32 1.442695, %v581_v40 }
 0x33f   : > { %v615_v2 = vmul.f32 1.442695, %v585_v62  ;;  %v2900_v15 = vpop.eup %2355  ;;  %v601_v26 = vmul.f32 1.442695, %v578_v8  ;;  %v599_v53 = vmul.f32 1.442695, %v577_v49 }
 0x341   : > { %2307 = vrot.lane.b32.xlu2 %v2306_v54, %s2478_s24  ;;  %2357 = vpow2.f32 %v615_v2 }
 0x342   : > { %2359 = vpow2.f32 %v601_v26 }
 0x343   : > { %2317 = vrot.lane.b32.xlu0 %v2316_v22, %s2478_s24  ;;  %v566_v37 = vpop.xlane.xlu2 %565  ;;  %2361 = vpow2.f32 %v599_v53  ;;  %v2336_v53 = vpack.i.bf16 %v2795_v10, %v2799_v11 }
 0x344   : > { %v2898_v14 = vpop.xlane.xlu0 %621  ;;  %v558_v41 = vpop.xlane.xlu1 %557  ;;  %2363 = vpow2.f32 %v607_v3  ;;  %v584_v32 = vsub.f32 %v2789_v6, %v566_v37 }
 0x345   : > { %v580_v36 = vsub.f32 %v2781_v63, %v558_v41 }
 0x347   : > { %v2905_v39 = vpop.eup %2357 }
 0x348   : > { %v2918_v33 = vpop.eup %2359 }
 0x349   : > { %2322 = vrot.lane.b32.xlu2 %v2321_v61, %s2478_s24  ;;  %v2922_v0 = vpop.eup %2361 }
 0x34a   : > { %v2928_v34 = vpop.eup %2363 }
 0x34b   : > { %v2894_v50 = vpop.xlane.xlu2 %619 }
 0x34c   : > { %635 = vadd.xlane.f32.xlu1 %v2892_v35  ;;  %v564_v51 = vpop.xlane.xlu1 %563 }
 0x34d   : > { %v583_v63 = vsub.f32 %v2787_v4, %v564_v51 }
 0x34f   : > { %v611_v44 = vmul.f32 1.442695, %v583_v63 }
 0x353   : > { %v1263_v5 = vpop.permute.xlu2 %1262 }
 0x354   : > { %641 = vadd.xlane.f32.xlu1 %v2900_v15  ;;  %2183 = vmatpush.xpose.msk.msrb.mxu0 %vm409_vm1, %v1263_v5  ;;  %v570_v20 = vpop.xlane.xlu1 %569 }
 0x355   : > { %v586_v46 = vsub.f32 %v2793_v9, %v570_v20 }
 0x357   : > { %v1261_v7 = vpop.permute.xlu0 %1260  ;;  %v617_v54 = vmul.f32 1.442695, %v586_v46 }
 0x358   : > { %2184 = vmatpush.xpose.msk.msrb.mxu0 %vm409_vm1, %v1261_v7  ;;  %v2331_v7 = vpack.i.bf16 %v2803_v12, %v2807_v13 }
 0x35c   : > { %647 = vadd.xlane.f32.xlu1 %v2905_v39  ;;  %2185 = vmatpush.xpose.msk.msrb.mxu0 %vm409_vm1, %v1259_v60  ;;  %v2940_v22 = vpop.xlane.xlu1 %623 }
 0x360   : > { %2186 = vmatpush.xpose.msk.msrb.mxu0 %vm409_vm1, %v1257_v19  ;;  %v613_v19 = vmul.f32 1.442695, %v584_v32 }
 0x364   : > { %2187 = vmatpush.xpose.msk.msrb.mxu0 %vm409_vm1, %v1255_v17  ;;  %v605_v17 = vmul.f32 1.442695, %v580_v36  ;;  %v2949_v9 = vpop.xlane.xlu1 %629 }
 0x366   : > { %2365 = vpow2.f32 %v605_v17 }
 0x367   : > { %2367 = vpow2.f32 %v613_v19 }
 0x368   : > { %2188 = vmatpush.xpose.msk.msrb.mxu0 %vm409_vm1, %v1253_v43  ;;  %2369 = vpow2.f32 %v611_v44 }
 0x369   : > { %2371 = vpow2.f32 %v617_v54 }
 0x36a   : > { %2373 = vrcp.f32 %v2894_v50 }
 0x36b   : > { %2189 = vmatmul.msk.f32.vlgmr.msrb.gmra.mxu0 %vm409_vm1, %v2795_v10  ;;  %2375 = vrcp.f32 %v2898_v14 }
 0x36c   : > { %v2931_v6 = vpop.eup %2365 }
 0x36d   : > { %633 = vadd.xlane.f32.xlu0 %v2918_v33  ;;  %v2937_v4 = vpop.eup %2367 }
 0x36e   : > { %v2942_v23 = vpop.eup %2369 }
 0x36f   : > { %v2947_v37 = vpop.eup %2371 }
 0x372   : > { %631 = vadd.xlane.f32.xlu2 %v2922_v0 }
 0x373   : > { %2190 = vmatmul.msk.f32.gmra.mxu0 %vm409_vm1, %v2799_v11 }
 0x375   : > { %639 = vadd.xlane.f32.xlu0 %v2928_v34 }
 0x37a   : > { %637 = vadd.xlane.f32.xlu2 %v2931_v6 }
 0x37b   : > { %2191 = vmatmul.msk.f32.gmra.mxu0 %vm409_vm1, %v2803_v12 }
 0x37c   : > { %v2960_v61 = vpop.permute.xlu1 %2267 }
 0x37d   : > { %645 = vadd.xlane.f32.xlu0 %v2937_v4 }
 0x382   : > { %643 = vadd.xlane.f32.xlu2 %v2942_v23  ;;  %v2956_v25 = vpop.xlane.xlu0 %627 }
 0x383   : > { %2192 = vmatmul.msk.f32.gmra.mxu0 %vm409_vm1, %v2807_v13 }
 0x384   : > { %v2283_v2 = vpop.permute.xlu1 %2282 }
 0x385   : > { %v2284_v41 = vunpack.i.l.bf16 %v2283_v2 }
 0x38a   : > { %649 = vadd.xlane.f32.xlu2 %v2947_v37 }
 0x38b   : > { %2193 = vmatmul.msk.f32.gmra.mxu0 %vm409_vm1, %v2829_v24 }
 0x38c   : > { %v2954_v43 = vpop.xlane.xlu2 %625  ;;  %v2298_v26 = vpop.permute.xlu1 %2297 }
 0x38d   : > { %v2300_v3 = vunpack.i.h.bf16 %v2298_v26 }
 0x391   : > { %2327 = vrot.lane.b32.xlu0 %v2326_v29, %s2478_s24 }
 0x393   : > { %2194 = vmatmul.msk.f32.gmra.mxu0 %vm409_vm1, %v2836_v28  ;;  %v2285_v28 = vunpack.i.h.bf16 %v2283_v2 }
 0x394   : > { %v2965_v31 = vpop.permute.xlu2 %2272  ;;  %v2313_v10 = vpop.permute.xlu1 %2312 }
 0x395   : > { %v2967_v60 = vpop.permute.xlu0 %2262  ;;  %v2275_v62 = vunpack.i.h.bf16 %v2965_v31  ;;  %v2315_v63 = vunpack.i.h.bf16 %v2313_v10  ;;  %v2314_v20 = vunpack.i.l.bf16 %v2313_v10  ;;  %v2274_v2 = vunpack.i.l.bf16 %v2965_v31 }
 0x396   : > { %v2264_v31 = vunpack.i.l.bf16 %v2967_v60 }
 0x397   : > { %747 = vmatpush.msrb.mxu2 %v2275_v62 }
 0x39b   : > { %2195 = vmatmul.msk.f32.gmra.mxu0 %vm409_vm1, %v2593_v38 }
 0x39c   : > { %v2293_v8 = vpop.permute.xlu2 %2292 }
 0x39d   : > { %v2278_v5 = vpop.permute.xlu0 %2277  ;;  %v2295_v12 = vunpack.i.h.bf16 %v2293_v8  ;;  %v2294_v13 = vunpack.i.l.bf16 %v2293_v8 }
 0x39e   : > { %v2280_v24 = vunpack.i.h.bf16 %v2278_v5  ;;  %v2279_v47 = vunpack.i.l.bf16 %v2278_v5  ;;  %v2269_v5 = vunpack.i.l.bf16 %v2960_v61 }
 0x3a0   : > { %748 = vmatpush.msrb.mxu2 %v2280_v24  ;;  %1622 = vmatpush.msrb.mxu3 %v2279_v47  ;;  %v651_v24 = vld [vmem:[%s2992_s27] sm:$0xff]  ;;  %v652_v47 = vld [vmem:[%s2992_s27 + $0x8] sm:$0xff] }
 0x3a1   : > { %vm667_vm2 = vcmp.ge.s32.totalorder %v651_v24, 2576980378  ;;  %vm668_vm3 = vcmp.ge.s32.totalorder %v652_v47, 2576980378 }
 0x3a2   : > { %2332 = vrot.lane.b32.xlu2 %v2331_v7, %s2478_s24  ;;  %749 = vmatpush.msrb.mxu2 %v2285_v28  ;;  %v658_v7 = vld [vmem:[%s2992_s27 + $0x38] sm:$0xff] }
 0x3a3   : > { %1623 = vmatpush.msrb.mxu3 %v2284_v41  ;;  %2196 = vmatmul.msk.f32.gmra.mxu0 %vm409_vm1, %v2601_v42  ;;  %v2299_v42 = vunpack.i.l.bf16 %v2298_v26  ;;  %vm674_vm9 = vcmp.ge.s32.totalorder %v658_v7, 2576980378  ;;  %v659_v41 = vld [vmem:[%s2992_s27 + $0x40] sm:$0xff] }
 0x3a4   : > { %v2308_v36 = vpop.permute.xlu2 %2307  ;;  %vm675_vm10 = vcmp.ge.s32.totalorder %v659_v41, 2576980378  ;;  %v2206_v41 = vld [vmem:[%s2992_s27 + $0x88] sm:$0xff] }
 0x3a5   : > { %v2288_v38 = vpop.permute.xlu0 %2287  ;;  %v2310_v11 = vunpack.i.h.bf16 %v2308_v36  ;;  %v2309_v19 = vunpack.i.l.bf16 %v2308_v36 }
 0x3a6   : > { %v2290_v49 = vunpack.i.h.bf16 %v2288_v38  ;;  %v2289_v40 = vunpack.i.l.bf16 %v2288_v38 }
 0x3a8   : > { %750 = vmatpush.msrb.mxu2 %v2290_v49  ;;  %1624 = vmatpush.msrb.mxu3 %v2289_v40 }
 0x3aa   : > { %2337 = vrot.lane.b32.xlu2 %v2336_v53, %s2478_s24  ;;  %751 = vmatpush.msrb.mxu2 %v2295_v12  ;;  %v660_v53 = vld [vmem:[%s2992_s27 + $0x48] sm:$0xff] }
 0x3ab   : > { %1625 = vmatpush.msrb.mxu3 %v2294_v13  ;;  %2197 = vmatmul.msk.f32.gmra.mxu0 %vm409_vm1, %v2609_v45  ;;  %vm676_vm11 = vcmp.ge.s32.totalorder %v660_v53, 2576980378  ;;  %v823_v53 = vand.u32 2147483648, %v2894_v50 }
 0x3ac   : > { %752 = vmatpush.msrb.mxu2 %v2300_v3  ;;  %v2323_v45 = vpop.permute.xlu2 %2322 }
 0x3ad   : > { %1626 = vmatpush.msrb.mxu3 %v2299_v42  ;;  %v2303_v51 = vpop.permute.xlu0 %2302  ;;  %v2325_v29 = vunpack.i.h.bf16 %v2323_v45  ;;  %v2324_v62 = vunpack.i.l.bf16 %v2323_v45 }
 0x3ae   : > { %v2305_v32 = vunpack.i.h.bf16 %v2303_v51  ;;  %v2304_v17 = vunpack.i.l.bf16 %v2303_v51 }
 0x3b0   : > { %753 = vmatpush.msrb.mxu2 %v2305_v32  ;;  %1627 = vmatpush.msrb.mxu3 %v2304_v17  ;;  %v662_v32 = vld [vmem:[%s2992_s27 + $0x58] sm:$0xff] }
 0x3b1   : > { %vm678_vm13 = vcmp.ge.s32.totalorder %v662_v32, 2576980378 }
 0x3b2   : > { %754 = vmatpush.msrb.mxu2 %v2310_v11  ;;  %1628 = vmatpush.msrb.mxu3 %v2309_v19  ;;  %v664_v11 = vld [vmem:[%s2992_s27 + $0x68] sm:$0xff]  ;;  %v665_v19 = vld [vmem:[%s2992_s27 + $0x70] sm:$0xff] }
 0x3b3   : > { %2198 = vmatmul.msk.f32.gmra.mxu0 %vm409_vm1, %v2617_v48  ;;  %v2270_v48 = vunpack.i.h.bf16 %v2960_v61  ;;  %v653_v61 = vld [vmem:[%s2992_s27 + $0x10] sm:$0xff]  ;;  %vm680_vm15 = vcmp.ge.s32.totalorder %v664_v11, 2576980378  ;;  %vm681_vm0 = vcmp.ge.s32.totalorder %v665_v19, 2576980378 }
 0x3b4   : > { %755 = vmatpush.msrb.mxu2 %v2315_v63  ;;  %1629 = vmatpush.msrb.mxu3 %v2314_v20  ;;  %vm669_vm4 = vcmp.ge.s32.totalorder %v653_v61, 2576980378 }
 0x3b5   : > { %v2318_v44 = vpop.permute.xlu0 %2317 }
 0x3b6   : > { %v2320_v46 = vunpack.i.h.bf16 %v2318_v44  ;;  %v2319_v54 = vunpack.i.l.bf16 %v2318_v44 }
 0x3b8   : > { %756 = vmatpush.msrb.mxu2 %v2320_v46  ;;  %1630 = vmatpush.msrb.mxu3 %v2319_v54 }
 0x3ba   : > { %757 = vmatpush.msrb.mxu2 %v2325_v29  ;;  %1631 = vmatpush.msrb.mxu3 %v2324_v62  ;;  %v2374_v62 = vpop.eup %2373 }
 0x3bb   : > { %2199 = vmatmul.msk.f32.gmra.mxu0 %vm409_vm1, %v2627_v52  ;;  %v2265_v52 = vunpack.i.h.bf16 %v2967_v60  ;;  %v654_v60 = vld [vmem:[%s2992_s27 + $0x18] sm:$0xff] }
 0x3bc   : > { %758 = vmatpush.msrb.mxu2 %v2274_v2  ;;  %vm670_vm5 = vcmp.ge.s32.totalorder %v654_v60, 2576980378  ;;  %v3117_v60 = vpop.eup %2375 }
 0x3be   : > { %759 = vmatpush.msrb.mxu2 %v2270_v48 }
 0x3c0   : > { %760 = vmatpush.msrb.mxu2 %v2269_v5  ;;  %v813_v5 = vmul.f32 %v2374_v62, %v2894_v50 }
 0x3c2   : > { %761 = vmatpush.msrb.mxu2 %v2265_v52  ;;  %v814_v47 = vsub.f32 1.0, %v813_v5 }
 0x3c3   : > { %2200 = vmatmul.msk.f32.gmra.mxu0 %vm409_vm1, %v2643_v55  ;;  %v655_v55 = vld [vmem:[%s2992_s27 + $0x20] sm:$0xff] }
 0x3c4   : > { %762 = vmatpush.msrb.mxu2 %v2264_v31  ;;  %vm671_vm6 = vcmp.ge.s32.totalorder %v655_v55, 2576980378  ;;  %v2205_v31 = vld [vmem:[%s2992_s27 + $0x80] sm:$0xff]  ;;  %v815_v7 = vmul.f32 %v2374_v62, %v814_v47 }
 0x3c5   : > { %2121 = vmatmul.msk.f32.vlgmr.msrb.gmra.mxu2 %vm667_vm2, %v2823_v16  ;;  %vm1542_vm2 = vcmp.ge.s32.totalorder %v2205_v31, 2576980378  ;;  %v836_v31 = vand.u32 2147483647, %v2898_v14 }
 0x3cb   : > { %2201 = vmatmul.msk.f32.gmra.mxu0 %vm409_vm1, %v2651_v56 }
 0x3cd   : > { %2122 = vmatmul.msk.f32.gmra.mxu2 %vm668_vm3, %v2818_v18  ;;  %v656_v18 = vld [vmem:[%s2992_s27 + $0x28] sm:$0xff]  ;;  %vm818_vm3 = vweird.f32 %v2374_v62 }
 0x3ce   : > { %vm672_vm7 = vcmp.ge.s32.totalorder %v656_v18, 2576980378 }
 0x3d3   : > { %2202 = vmatmul.msk.f32.gmra.mxu0 %vm409_vm1, %v2659_v57 }
 0x3d5   : > { %2123 = vmatmul.msk.f32.gmra.mxu2 %vm669_vm4, %v2833_v27  ;;  %v657_v27 = vld [vmem:[%s2992_s27 + $0x30] sm:$0xff]  ;;  %vm1543_vm4 = vcmp.ge.s32.totalorder %v2206_v41, 2576980378 }
 0x3d6   : > { %vm673_vm8 = vcmp.ge.s32.totalorder %v657_v27, 2576980378  ;;  %v828_v27 = vmul.f32 %v3117_v60, %v2898_v14 }
 0x3db   : > { %2203 = vmatmul.msk.f32.gmra.mxu0 %vm409_vm1, %v2667_v58 }
 0x3dd   : > { %2124 = vmatmul.msk.f32.gmra.mxu2 %vm670_vm5, %v2854_v30  ;;  %vm817_vm5 = vweird.f32 %v2894_v50 }
 0x3e0   : > { %v3020_v57 = vpop.xlane.xlu0 %633 }
 0x3e3   : > { %2204 = vmatmul.msk.f32.gmra.mxu0 %vm409_vm1, %v2679_v59 }
 0x3e5   : > { %v3017_v56 = vpop.xlane.xlu2 %631  ;;  %2125 = vmatmul.msk.f32.gmra.mxu2 %vm671_vm6, %v2848_v1  ;;  %vm819_vm6 = vmor %vm817_vm5, %vm818_vm3 }
 0x3e8   : > { %v3023_v16 = vpop.f32.mrf.mxu0  ;;  %v3032_v30 = vpop.xlane.xlu0 %639 }
 0x3e9   : > { %1413 = vmax.xlane.f32.xlu1 %v3023_v16 }
 0x3ed   : > { %v3026_v58 = vpop.xlane.xlu2 %637  ;;  %2126 = vmatmul.msk.f32.gmra.mxu2 %vm672_vm7, %v2838_v21 }
 0x3f0   : > { %v3030_v59 = vpop.f32.mrf.mxu0  ;;  %v3042_v21 = vpop.xlane.xlu0 %645 }
 0x3f1   : > { %1415 = vmax.xlane.f32.xlu0 %v3030_v59 }
 0x3f5   : > { %v3035_v1 = vpop.xlane.xlu2 %643  ;;  %2127 = vmatmul.msk.f32.gmra.mxu2 %vm673_vm8, %v2922_v0  ;;  %vm833_vm8 = vweird.f32 %v3117_v60 }
 0x3f8   : > { %v3039_v28 = vpop.f32.mrf.mxu0 }
 0x3f9   : > { %1417 = vmax.xlane.f32.xlu2 %v3039_v28 }
 0x3fd   : > { %v3044_v8 = vpop.xlane.xlu2 %649  ;;  %2128 = vmatmul.msk.f32.gmra.mxu2 %vm674_vm9, %v2918_v33 }
 0x400   : > { %v3048_v26 = vpop.f32.mrf.mxu0 }
 0x401   : > { %1419 = vmax.xlane.f32.xlu1 %v3048_v26 }
 0x403   : > { %v2328_v0 = vpop.permute.xlu0 %2327 }
 0x404   : > { %v2329_v38 = vunpack.i.l.bf16 %v2328_v0  ;;  %v2330_v40 = vunpack.i.h.bf16 %v2328_v0 }
 0x405   : > { %v2333_v49 = vpop.permute.xlu2 %2332  ;;  %2129 = vmatmul.msk.f32.gmra.mxu2 %vm675_vm10, %v2892_v35  ;;  %v661_v35 = vld [vmem:[%s2992_s27 + $0x50] sm:$0xff]  ;;  %vm832_vm10 = vweird.f32 %v2898_v14 }
 0x406   : > { %1632 = vmatpush.msrb.mxu3 %v2329_v38  ;;  %v2334_v13 = vunpack.i.l.bf16 %v2333_v49  ;;  %v2335_v33 = vunpack.i.h.bf16 %v2333_v49  ;;  %vm677_vm12 = vcmp.ge.s32.totalorder %v661_v35, 2576980378  ;;  %v829_v49 = vsub.f32 1.0, %v828_v27 }
 0x408   : > { %v3053_v12 = vpop.f32.mrf.mxu0  ;;  %1633 = vmatpush.msrb.mxu3 %v2330_v40  ;;  %v816_v40 = vadd.f32 %v2374_v62, %v815_v7 }
 0x409   : > { %1421 = vmax.xlane.f32.xlu1 %v3053_v12 }
 0x40a   : > { %1634 = vmatpush.msrb.mxu3 %v2334_v13  ;;  %v820_v32 = vsel %vm819_vm6, %v2374_v62, %v816_v40 }
 0x40c   : > { %1635 = vmatpush.msrb.mxu3 %v2335_v33  ;;  %v821_v33 = vand.u32 2147483647, %v2894_v50 }
 0x40d   : > { %v2338_v3 = vpop.permute.xlu2 %2337  ;;  %2130 = vmatmul.msk.f32.gmra.mxu2 %vm676_vm11, %v2931_v6  ;;  %v663_v6 = vld [vmem:[%s2992_s27 + $0x60] sm:$0xff]  ;;  %vm834_vm11 = vmor %vm832_vm10, %vm833_vm8 }
 0x40e   : > { %v2339_v36 = vunpack.i.l.bf16 %v2338_v3  ;;  %v2340_v51 = vunpack.i.h.bf16 %v2338_v3  ;;  %vm679_vm14 = vcmp.ge.s32.totalorder %v663_v6, 2576980378  ;;  %vm822_vm7 = vcmp.eq.f32.partialorder %v821_v33, 8.507059e+37  ;;  %v2207_v6 = vld [vmem:[%s2992_s27 + $0x90] sm:$0xff] }
 0x40f   : > { %vm1544_vm9 = vcmp.ge.s32.totalorder %v2207_v6, 2576980378  ;;  %v851_v33 = vand.u32 2147483647, %v2940_v22 }
 0x410   : > { %v3058_v42 = vpop.f32.mrf.mxu0  ;;  %1636 = vmatpush.msrb.mxu3 %v2339_v36 }
 0x411   : > { %1423 = vmax.xlane.f32.xlu0 %v3058_v42 }
 0x412   : > { %1637 = vmatpush.msrb.mxu3 %v2340_v51  ;;  %v830_v51 = vmul.f32 %v3117_v60, %v829_v49 }
 0x414   : > { %v831_v50 = vadd.f32 %v3117_v60, %v830_v51 }
 0x415   : > { %2131 = vmatmul.msk.f32.gmra.mxu2 %vm677_vm12, %v2928_v34  ;;  %vm837_vm12 = vcmp.eq.f32.partialorder %v836_v31, 8.507059e+37 }
 0x418   : > { %v3063_v17 = vpop.f32.mrf.mxu0 }
 0x419   : > { %1425 = vmax.xlane.f32.xlu1 %v3063_v17 }
 0x41d   : > { %2132 = vmatmul.msk.f32.gmra.mxu2 %vm678_vm13, %v2900_v15  ;;  %v666_v15 = vld [vmem:[%s2992_s27 + $0x78] sm:$0xff] }
 0x41e   : > { %vm682_vm1 = vcmp.ge.s32.totalorder %v666_v15, 2576980378 }
 0x420   : > { %v3068_v10 = vpop.f32.mrf.mxu0 }
 0x421   : > { %1427 = vmax.xlane.f32.xlu0 %v3068_v10 }
 0x425   : > { %2133 = vmatmul.msk.f32.gmra.mxu2 %vm679_vm14, %v2942_v23  ;;  %v3087_v23 = vpop.xlane.xlu1 %635  ;;  %vm847_vm14 = vweird.f32 %v2940_v22 }
 0x428   : > { %v3073_v34 = vpop.f32.mrf.mxu0 }
 0x429   : > { %1429 = vmax.xlane.f32.xlu2 %v3073_v34 }
 0x42d   : > { %2134 = vmatmul.msk.f32.gmra.mxu2 %vm680_vm15, %v2937_v4  ;;  %v3095_v44 = vpop.xlane.xlu1 %641 }
 0x430   : > { %v3078_v63 = vpop.f32.mrf.mxu0 }
 0x431   : > { %1431 = vmax.xlane.f32.xlu1 %v3078_v63 }
 0x435   : > { %2135 = vmatmul.msk.f32.gmra.mxu2 %vm681_vm0, %v2905_v39  ;;  %v3100_v46 = vpop.xlane.xlu1 %647 }
 0x438   : > { %v3083_v20 = vpop.f32.mrf.mxu0 }
 0x439   : > { %1433 = vmax.xlane.f32.xlu0 %v3083_v20 }
 0x43d   : > { %2136 = vmatmul.msk.f32.gmra.mxu2 %vm682_vm1, %v2947_v37  ;;  %vm852_vm1 = vcmp.eq.f32.partialorder %v851_v33, 8.507059e+37 }
 0x440   : > { %v3089_v45 = vpop.f32.mrf.mxu0 }
 0x441   : > { %1435 = vmax.xlane.f32.xlu2 %v3089_v45 }
 0x448   : > { %v3092_v4 = vpop.f32.mrf.mxu0  ;;  %v3103_v37 = vpop.f32.mrf.mxu2 }
 0x449   : > { %1437 = vmax.xlane.f32.xlu1 %v3092_v4 }
 0x450   : > { %v3097_v39 = vpop.f32.mrf.mxu0  ;;  %v3113_v52 = vpop.f32.mrf.mxu2 }
 0x451   : > { %1439 = vmax.xlane.f32.xlu0 %v3097_v39 }
 0x458   : > { %v3105_v54 = vpop.f32.mrf.mxu0  ;;  %v3124_v0 = vpop.f32.mrf.mxu2 }
 0x459   : > { %1441 = vmax.xlane.f32.xlu2 %v3105_v54 }
 0x45c   : > { %v1414_v29 = vpop.xlane.xlu1 %1413 }
 0x45d   : > { %v1445_v2 = vsub.f32 %v3023_v16, %v1414_v29 }
 0x45f   : > { %v1461_v48 = vmul.f32 1.442695, %v1445_v2  ;;  %v838_v2 = vand.u32 2147483648, %v2898_v14  ;;  %v2208_v14 = vld [vmem:[%s2992_s27 + $0x98] sm:$0xff] }
 0x460   : > { %v3111_v24 = vpop.f32.mrf.mxu0  ;;  %vm1545_vm15 = vcmp.ge.s32.totalorder %v2208_v14, 2576980378 }
 0x461   : > { %2377 = vpow2.f32 %v1461_v48  ;;  %1443 = vmax.xlane.f32.xlu1 %v3111_v24  ;;  %v3142_v48 = vpop.f32.mrf.mxu2  ;;  %v839_v27 = vor.u32 1.1754944e-38, %v838_v2  ;;  %v868_v2 = vand.u32 2147483648, %v2954_v43 }
 0x462   : > { %2379 = vrcp.f32 %v2940_v22 }
 0x464   : > { %v1416_v61 = vpop.xlane.xlu0 %1415 }
 0x465   : > { %v1446_v55 = vsub.f32 %v3030_v59, %v1416_v61 }
 0x467   : > { %v2378_v18 = vpop.eup %2377  ;;  %v1463_v16 = vmul.f32 1.442695, %v1446_v55 }
 0x468   : > { %1493 = vadd.xlane.f32.xlu2 %v2378_v18  ;;  %2221 = vmatmul.msk.f32.vlgmr.msrb.gmra.mxu3 %vm1542_vm2, %v2378_v18  ;;  %v3126_v38 = vpop.eup %2379 }
 0x469   : > { %2381 = vpow2.f32 %v1463_v16  ;;  %v843_v36 = vmul.f32 %v3126_v38, %v2940_v22  ;;  %vm848_vm13 = vweird.f32 %v3126_v38 }
 0x46a   : > { %2383 = vrcp.f32 %v2954_v43  ;;  %vm3162_vm0 = vmor %vm847_vm14, %vm848_vm13  ;;  %vm892_vm13 = vweird.f32 %v2949_v9 }
 0x46b   : > { %v844_v11 = vsub.f32 1.0, %v843_v36 }
 0x46c   : > { %v1418_v59 = vpop.xlane.xlu2 %1417 }
 0x46d   : > { %v1447_v13 = vsub.f32 %v3039_v28, %v1418_v59  ;;  %v824_v28 = vor.u32 1.1754944e-38, %v823_v53  ;;  %v845_v61 = vmul.f32 %v3126_v38, %v844_v11 }
 0x46f   : > { %v2382_v3 = vpop.eup %2381  ;;  %v1465_v35 = vmul.f32 1.442695, %v1447_v13  ;;  %v825_v19 = vsel %vm822_vm7, %v824_v28, %v820_v32  ;;  %v846_v41 = vadd.f32 %v3126_v38, %v845_v61 }
 0x470   : > { %1495 = vadd.xlane.f32.xlu1 %v2382_v3  ;;  %2222 = vmatmul.msk.f32.gmra.mxu3 %vm1543_vm4, %v2382_v3  ;;  %v3139_v29 = vpop.eup %2383  ;;  %v826_v5 = vmul.f32 1.1111112, %v825_v19  ;;  %vm862_vm4 = vweird.f32 %v2954_v43 }
 0x471   : > { %2385 = vpow2.f32 %v1465_v35  ;;  %v858_v18 = vmul.f32 %v3139_v29, %v2954_v43  ;;  %v850_v36 = vsel %vm3162_vm0, %v3126_v38, %v846_v41  ;;  %v3170_v35 = vpop.f32.mrf.mxu2  ;;  %vm863_vm2 = vweird.f32 %v3139_v29 }
 0x472   : > { %2387 = vrcp.f32 %v2956_v25  ;;  %v1052_v16 = vmul.f32 %v826_v5, %v3103_v37  ;;  %v853_v37 = vand.u32 2147483648, %v2940_v22  ;;  %v2209_v22 = vld [vmem:[%s2992_s27 + $0xa0] sm:$0xff]  ;;  %v866_v5 = vand.u32 2147483647, %v2954_v43  ;;  %vm864_vm5 = vmor %vm862_vm4, %vm863_vm2  ;;  %v2210_v43 = vld [vmem:[%s2992_s27 + $0xa8] sm:$0xff] }
 0x473   : > { %v859_v49 = vsub.f32 1.0, %v858_v18  ;;  %vm1546_vm3 = vcmp.ge.s32.totalorder %v2209_v22, 2576980378  ;;  %vm1547_vm8 = vcmp.ge.s32.totalorder %v2210_v43, 2576980378 }
 0x474   : > { %v1420_v15 = vpop.xlane.xlu1 %1419  ;;  %v854_v6 = vor.u32 1.1754944e-38, %v853_v37  ;;  %vm867_vm6 = vcmp.eq.f32.partialorder %v866_v5, 8.507059e+37  ;;  %v881_v37 = vand.u32 2147483647, %v2956_v25 }
 0x475   : > { %v1448_v62 = vsub.f32 %v3048_v26, %v1420_v15  ;;  %v835_v26 = vsel %vm834_vm11, %v3117_v60, %v831_v50  ;;  %v860_v32 = vmul.f32 %v3139_v29, %v859_v49 }
 0x476   : > { %v840_v7 = vsel %vm837_vm12, %v839_v27, %v835_v26  ;;  %v855_v11 = vsel %vm852_vm1, %v854_v6, %v850_v36  ;;  %vm882_vm11 = vcmp.eq.f32.partialorder %v881_v37, 8.507059e+37 }
 0x477   : > { %v2386_v47 = vpop.eup %2385  ;;  %v1467_v55 = vmul.f32 1.442695, %v1448_v62  ;;  %v841_v53 = vmul.f32 1.1111112, %v840_v7  ;;  %v861_v50 = vadd.f32 %v3139_v29, %v860_v32  ;;  %v856_v62 = vmul.f32 1.1111112, %v855_v11 }
 0x478   : > { %1497 = vadd.xlane.f32.xlu2 %v2386_v47  ;;  %2223 = vmatmul.msk.f32.gmra.mxu3 %vm1544_vm9, %v2386_v47  ;;  %v3156_v59 = vpop.eup %2387  ;;  %vm877_vm9 = vweird.f32 %v2956_v25 }
 0x479   : > { %2389 = vpow2.f32 %v1467_v55  ;;  %v1053_v28 = vmul.f32 %v841_v53, %v3113_v52  ;;  %v1054_v18 = vmul.f32 %v856_v62, %v3124_v0  ;;  %v3191_v26 = vpop.f32.mrf.mxu2  ;;  %vm878_vm7 = vweird.f32 %v3156_v59 }
 0x47a   : > { %1068 = vxpose.xlu0.b32.start [1/16] (narrow) %v1052_v16, 8  ;;  %2391 = vrcp.f32 %v2949_v9  ;;  %v869_v16 = vor.u32 1.1754944e-38, %v868_v2  ;;  %v883_v0 = vand.u32 2147483648, %v2956_v25  ;;  %vm879_vm10 = vmor %vm877_vm9, %vm878_vm7 }
 0x47c   : > { %v1422_v40 = vpop.xlane.xlu1 %1421  ;;  %v884_v36 = vor.u32 1.1754944e-38, %v883_v0 }
 0x47d   : > { %v1449_v60 = vsub.f32 %v3053_v12, %v1422_v40  ;;  %v873_v12 = vmul.f32 %v3156_v59, %v2956_v25  ;;  %v2211_v25 = vld [vmem:[%s2992_s27 + $0xb0] sm:$0xff] }
 0x47e   : > { %vm1548_vm14 = vcmp.ge.s32.totalorder %v2211_v25, 2576980378 }
 0x47f   : > { %v2390_v3 = vpop.eup %2389  ;;  %v1469_v51 = vmul.f32 1.442695, %v1449_v60  ;;  %v874_v38 = vsub.f32 1.0, %v873_v12 }
 0x480   : > { %1499 = vadd.xlane.f32.xlu1 %v2390_v3  ;;  %2224 = vmatmul.msk.f32.gmra.mxu3 %vm1545_vm15, %v2390_v3  ;;  %v3177_v19 = vpop.eup %2391 }
 0x481   : > { %2393 = vpow2.f32 %v1469_v51  ;;  %v888_v47 = vmul.f32 %v3177_v19, %v2949_v9  ;;  %v875_v55 = vmul.f32 %v3156_v59, %v874_v38  ;;  %vm893_vm12 = vweird.f32 %v3177_v19  ;;  %v3211_v32 = vpop.f32.mrf.mxu2 }
 0x482   : > { %1069 = vxpose.xlu0.b32.cont [2/16] (narrow) %v1053_v28, 8  ;;  %2395 = vrcp.f32 %v3017_v56  ;;  %vm3219_vm15 = vmor %vm892_vm13, %vm893_vm12  ;;  %vm937_vm12 = vweird.f32 %v3087_v23 }
 0x483   : > { %v889_v27 = vsub.f32 1.0, %v888_v47  ;;  %v876_v7 = vadd.f32 %v3156_v59, %v875_v55 }
 0x484   : > { %v1424_v15 = vpop.xlane.xlu0 %1423 }
 0x485   : > { %v1450_v52 = vsub.f32 %v3058_v42, %v1424_v15  ;;  %v865_v42 = vsel %vm864_vm5, %v3139_v29, %v861_v50  ;;  %v890_v53 = vmul.f32 %v3177_v19, %v889_v27  ;;  %v896_v50 = vand.u32 2147483647, %v2949_v9 }
 0x486   : > { %v870_v14 = vsel %vm867_vm6, %v869_v16, %v865_v42  ;;  %v913_v42 = vand.u32 2147483648, %v3017_v56  ;;  %v911_v27 = vand.u32 2147483647, %v3017_v56 }
 0x487   : > { %v2394_v31 = vpop.eup %2393  ;;  %v1471_v61 = vmul.f32 1.442695, %v1450_v52  ;;  %v871_v40 = vmul.f32 1.1111112, %v870_v14  ;;  %v891_v12 = vadd.f32 %v3177_v19, %v890_v53  ;;  %vm897_vm0 = vcmp.eq.f32.partialorder %v896_v50, 8.507059e+37 }
 0x488   : > { %1501 = vadd.xlane.f32.xlu2 %v2394_v31  ;;  %2225 = vmatmul.msk.f32.gmra.mxu3 %vm1546_vm3, %v2394_v31  ;;  %v3196_v49 = vpop.eup %2395  ;;  %vm907_vm3 = vweird.f32 %v3017_v56  ;;  %vm912_vm5 = vcmp.eq.f32.partialorder %v911_v27, 8.507059e+37  ;;  %v958_v27 = vand.u32 2147483648, %v3026_v58 }
 0x489   : > { %2397 = vpow2.f32 %v1471_v61  ;;  %v903_v33 = vmul.f32 %v3196_v49, %v3017_v56  ;;  %v1055_v3 = vmul.f32 %v871_v40, %v3142_v48  ;;  %v898_v48 = vand.u32 2147483648, %v2949_v9  ;;  %v2212_v9 = vld [vmem:[%s2992_s27 + $0xb8] sm:$0xff]  ;;  %v3237_v16 = vpop.f32.mrf.mxu2  ;;  %v2213_v56 = vld [vmem:[%s2992_s27 + $0xc0] sm:$0xff] }
 0x48a   : > { %1070 = vxpose.xlu0.b32.cont [3/16] (narrow) %v1054_v18, 8  ;;  %2399 = vrcp.f32 %v3020_v57  ;;  %v895_v2 = vsel %vm3219_vm15, %v3177_v19, %v891_v12  ;;  %vm908_vm1 = vweird.f32 %v3196_v49  ;;  %vm1549_vm2 = vcmp.ge.s32.totalorder %v2212_v9, 2576980378 }
 0x48b   : > { %v904_v28 = vsub.f32 1.0, %v903_v33  ;;  %v899_v31 = vor.u32 1.1754944e-38, %v898_v48  ;;  %vm909_vm4 = vmor %vm907_vm3, %vm908_vm1  ;;  %v914_v40 = vor.u32 1.1754944e-38, %v913_v42  ;;  %vm1550_vm7 = vcmp.ge.s32.totalorder %v2213_v56, 2576980378 }
 0x48c   : > { %v1426_v41 = vpop.xlane.xlu1 %1425  ;;  %v959_v56 = vor.u32 1.1754944e-38, %v958_v27 }
 0x48d   : > { %v1451_v29 = vsub.f32 %v3063_v17, %v1426_v41  ;;  %v880_v17 = vsel %vm879_vm10, %v3156_v59, %v876_v7  ;;  %v905_v62 = vmul.f32 %v3196_v49, %v904_v28  ;;  %v900_v47 = vsel %vm897_vm0, %v899_v31, %v895_v2 }
 0x48e   : > { %v885_v51 = vsel %vm882_vm11, %v884_v36, %v880_v17  ;;  %v901_v43 = vmul.f32 1.1111112, %v900_v47  ;;  %v926_v17 = vand.u32 2147483647, %v3020_v57 }
 0x48f   : > { %v2398_v60 = vpop.eup %2397  ;;  %v1473_v13 = vmul.f32 1.442695, %v1451_v29  ;;  %v886_v11 = vmul.f32 1.1111112, %v885_v51  ;;  %v906_v19 = vadd.f32 %v3196_v49, %v905_v62 }
 0x490   : > { %1503 = vadd.xlane.f32.xlu1 %v2398_v60  ;;  %2226 = vmatmul.msk.f32.gmra.mxu3 %vm1547_vm8, %v2398_v60  ;;  %v3213_v22 = vpop.eup %2399  ;;  %v1057_v29 = vmul.f32 %v901_v43, %v3191_v26  ;;  %v928_v26 = vand.u32 2147483648, %v3020_v57  ;;  %vm922_vm8 = vweird.f32 %v3020_v57  ;;  %vm927_vm10 = vcmp.eq.f32.partialorder %v926_v17, 8.507059e+37 }
 0x491   : > { %2401 = vpow2.f32 %v1473_v13  ;;  %v1056_v5 = vmul.f32 %v886_v11, %v3170_v35  ;;  %vm923_vm6 = vweird.f32 %v3213_v22  ;;  %v788_v51 = vpop.f32.mrf.mxu2 }
 0x492   : > { %1071 = vxpose.xlu0.b32.cont [4/16] (narrow) %v1055_v3, 8  ;;  %2403 = vrcp.f32 %v3087_v23  ;;  %vm924_vm9 = vmor %vm922_vm8, %vm923_vm6  ;;  %v929_v48 = vor.u32 1.1754944e-38, %v928_v26 }
 0x494   : > { %v1428_v6 = vpop.xlane.xlu0 %1427 }
 0x495   : > { %v1452_v59 = vsub.f32 %v3068_v10, %v1428_v6  ;;  %v918_v10 = vmul.f32 %v3213_v22, %v3020_v57  ;;  %v2214_v57 = vld [vmem:[%s2992_s27 + $0xc8] sm:$0xff] }
 0x496   : > { %vm1551_vm13 = vcmp.ge.s32.totalorder %v2214_v57, 2576980378 }
 0x497   : > { %v2402_v15 = vpop.eup %2401  ;;  %v1475_v52 = vmul.f32 1.442695, %v1452_v59  ;;  %v919_v55 = vsub.f32 1.0, %v918_v10  ;;  %v941_v10 = vand.u32 2147483647, %v3087_v23 }
 0x498   : > { %1505 = vadd.xlane.f32.xlu2 %v2402_v15  ;;  %2227 = vmatmul.msk.f32.gmra.mxu3 %vm1548_vm14, %v2402_v15  ;;  %v3232_v61 = vpop.eup %2403 }
 0x499   : > { %2405 = vpow2.f32 %v1475_v52  ;;  %v933_v7 = vmul.f32 %v3232_v61, %v3087_v23  ;;  %v920_v0 = vmul.f32 %v3213_v22, %v919_v55  ;;  %vm938_vm11 = vweird.f32 %v3232_v61 }
 0x49a   : > { %1072 = vxpose.xlu0.b32.cont [5/16] (narrow) %v1056_v5, 8  ;;  %2407 = vrcp.f32 %v3026_v58  ;;  %vm3272_vm14 = vmor %vm937_vm12, %vm938_vm11  ;;  %vm942_vm15 = vcmp.eq.f32.partialorder %v941_v10, 8.507059e+37  ;;  %vm982_vm11 = vweird.f32 %v3095_v44  ;;  %v986_v52 = vand.u32 2147483647, %v3095_v44 }
 0x49b   : > { %v934_v37 = vsub.f32 1.0, %v933_v7  ;;  %v921_v53 = vadd.f32 %v3213_v22, %v920_v0  ;;  %v956_v7 = vand.u32 2147483647, %v3026_v58 }
 0x49c   : > { %v1430_v18 = vpop.xlane.xlu2 %1429 }
 0x49d   : > { %v1453_v35 = vsub.f32 %v3073_v34, %v1430_v18  ;;  %v910_v34 = vsel %vm909_vm4, %v3196_v49, %v906_v19  ;;  %v935_v25 = vmul.f32 %v3232_v61, %v934_v37  ;;  %v925_v6 = vsel %vm924_vm9, %v3213_v22, %v921_v53  ;;  %v791_v19 = vpop.f32.mrf.mxu2 }
 0x49e   : > { %v915_v60 = vsel %vm912_vm5, %v914_v40, %v910_v34  ;;  %v930_v59 = vsel %vm927_vm10, %v929_v48, %v925_v6  ;;  %vm957_vm4 = vcmp.eq.f32.partialorder %v956_v7, 8.507059e+37 }
 0x49f   : > { %v2406_v14 = vpop.eup %2405  ;;  %v1477_v41 = vmul.f32 1.442695, %v1453_v35  ;;  %v916_v3 = vmul.f32 1.1111112, %v915_v60  ;;  %v936_v11 = vadd.f32 %v3232_v61, %v935_v25  ;;  %v931_v2 = vmul.f32 1.1111112, %v930_v59 }
 0x4a0   : > { %1507 = vadd.xlane.f32.xlu1 %v2406_v14  ;;  %2228 = vmatmul.msk.f32.gmra.mxu3 %vm1549_vm2, %v2406_v14  ;;  %v3251_v33 = vpop.eup %2407  ;;  %vm952_vm2 = vweird.f32 %v3026_v58 }
 0x4a1   : > { %2409 = vpow2.f32 %v1477_v41  ;;  %v948_v28 = vmul.f32 %v3251_v33, %v3026_v58  ;;  %v940_v5 = vsel %vm3272_vm14, %v3232_v61, %v936_v11  ;;  %v1059_v47 = vmul.f32 %v931_v2, %v3237_v16  ;;  %v2216_v58 = vld [vmem:[%s2992_s27 + $0xd8] sm:$0xff] }
 0x4a2   : > { %1073 = vxpose.xlu0.b32.cont [6/16] (narrow) %v1057_v29, 8  ;;  %2411 = vrcp.f32 %v3032_v30  ;;  %vm953_vm0 = vweird.f32 %v3251_v33  ;;  %vm1553_vm6 = vcmp.ge.s32.totalorder %v2216_v58, 2576980378  ;;  %vm987_vm14 = vcmp.eq.f32.partialorder %v986_v52, 8.507059e+37 }
 0x4a3   : > { %v949_v38 = vsub.f32 1.0, %v948_v28  ;;  %vm954_vm3 = vmor %vm952_vm2, %vm953_vm0 }
 0x4a4   : > { %v1432_v13 = vpop.xlane.xlu1 %1431 }
 0x4a5   : > { %v1454_v49 = vsub.f32 %v3078_v63, %v1432_v13  ;;  %v1058_v63 = vmul.f32 %v916_v3, %v3211_v32  ;;  %v943_v32 = vand.u32 2147483648, %v3087_v23  ;;  %v950_v9 = vmul.f32 %v3251_v33, %v949_v38  ;;  %v2215_v23 = vld [vmem:[%s2992_s27 + $0xd0] sm:$0xff]  ;;  %v794_v53 = vpop.f32.mrf.mxu2 }
 0x4a6   : > { %vm1552_vm1 = vcmp.ge.s32.totalorder %v2215_v23, 2576980378  ;;  %v973_v3 = vand.u32 2147483648, %v3032_v30 }
 0x4a7   : > { %v2410_v36 = vpop.eup %2409  ;;  %v1479_v12 = vmul.f32 1.442695, %v1454_v49  ;;  %v944_v55 = vor.u32 1.1754944e-38, %v943_v32  ;;  %v951_v35 = vadd.f32 %v3251_v33, %v950_v9 }
 0x4a8   : > { %1509 = vadd.xlane.f32.xlu2 %v2410_v36  ;;  %2229 = vmatmul.msk.f32.gmra.mxu3 %vm1550_vm7, %v2410_v36  ;;  %v3266_v15 = vpop.eup %2411  ;;  %vm967_vm7 = vweird.f32 %v3032_v30  ;;  %v971_v36 = vand.u32 2147483647, %v3032_v30  ;;  %v974_v6 = vor.u32 1.1754944e-38, %v973_v3 }
 0x4a9   : > { %2413 = vpow2.f32 %v1479_v12  ;;  %v945_v18 = vsel %vm942_vm15, %v944_v55, %v940_v5  ;;  %vm968_vm5 = vweird.f32 %v3266_v15 }
 0x4aa   : > { %1074 = vxpose.xlu0.b32.cont [7/16] (narrow) %v1058_v63, 8  ;;  %2415 = vrcp.f32 %v3095_v44  ;;  %v946_v14 = vmul.f32 1.1111112, %v945_v18  ;;  %vm969_vm8 = vmor %vm967_vm7, %vm968_vm5  ;;  %vm972_vm9 = vcmp.eq.f32.partialorder %v971_v36, 8.507059e+37 }
 0x4ac   : > { %v1434_v50 = vpop.xlane.xlu0 %1433  ;;  %v1060_v40 = vmul.f32 %v946_v14, %v788_v51 }
 0x4ad   : > { %v1455_v22 = vsub.f32 %v3083_v20, %v1434_v50  ;;  %v963_v20 = vmul.f32 %v3266_v15, %v3032_v30  ;;  %v2217_v30 = vld [vmem:[%s2992_s27 + $0xe0] sm:$0xff]  ;;  %v797_v50 = vpop.f32.mrf.mxu2 }
 0x4ae   : > { %vm1554_vm12 = vcmp.ge.s32.totalorder %v2217_v30, 2576980378  ;;  %v1031_v30 = vand.u32 2147483647, %v3100_v46 }
 0x4af   : > { %v2414_v62 = vpop.eup %2413  ;;  %v1481_v31 = vmul.f32 1.442695, %v1455_v22  ;;  %v964_v61 = vsub.f32 1.0, %v963_v20 }
 0x4b0   : > { %1511 = vadd.xlane.f32.xlu1 %v2414_v62  ;;  %2230 = vmatmul.msk.f32.gmra.mxu3 %vm1551_vm13, %v2414_v62  ;;  %v3285_v42 = vpop.eup %2415 }
 0x4b1   : > { %2417 = vpow2.f32 %v1481_v31  ;;  %v978_v0 = vmul.f32 %v3285_v42, %v3095_v44  ;;  %v965_v34 = vmul.f32 %v3266_v15, %v964_v61  ;;  %vm983_vm10 = vweird.f32 %v3285_v42 }
 0x4b2   : > { %1075 = vxpose.xlu0.b32.cont [8/16] (narrow) %v1059_v47, 8  ;;  %2419 = vrcp.f32 %v3035_v1  ;;  %vm3321_vm13 = vmor %vm982_vm11, %vm983_vm10  ;;  %v2218_v47 = vld [vmem:[%s2992_s27 + $0xe8] sm:$0xff]  ;;  %vm1027_vm11 = vweird.f32 %v3100_v46 }
 0x4b3   : > { %v979_v37 = vsub.f32 1.0, %v978_v0  ;;  %v966_v13 = vadd.f32 %v3266_v15, %v965_v34  ;;  %vm1555_vm0 = vcmp.ge.s32.totalorder %v2218_v47, 2576980378 }
 0x4b4   : > { %v1436_v43 = vpop.xlane.xlu2 %1435 }
 0x4b5   : > { %v1456_v16 = vsub.f32 %v3089_v45, %v1436_v43  ;;  %v955_v45 = vsel %vm954_vm3, %v3251_v33, %v951_v35  ;;  %v980_v51 = vmul.f32 %v3285_v42, %v979_v37  ;;  %v1001_v43 = vand.u32 2147483647, %v3035_v1  ;;  %v800_v14 = vpop.f32.mrf.mxu2 }
 0x4b6   : > { %v960_v60 = vsel %vm957_vm4, %v959_v56, %v955_v45  ;;  %v1018_v37 = vand.u32 2147483648, %v3042_v21 }
 0x4b7   : > { %v2418_v41 = vpop.eup %2417  ;;  %v1483_v29 = vmul.f32 1.442695, %v1456_v16  ;;  %v961_v17 = vmul.f32 1.1111112, %v960_v60  ;;  %v981_v57 = vadd.f32 %v3285_v42, %v980_v51  ;;  %vm1002_vm3 = vcmp.eq.f32.partialorder %v1001_v43, 8.507059e+37  ;;  %v2220_v51 = vld [vmem:[%s2992_s27 + $0xf8] sm:$0xff] }
 0x4b8   : > { %1513 = vadd.xlane.f32.xlu2 %v2418_v41  ;;  %2231 = vmatmul.msk.f32.gmra.mxu3 %vm1552_vm1, %v2418_v41  ;;  %v3301_v49 = vpop.eup %2419  ;;  %vm997_vm1 = vweird.f32 %v3035_v1  ;;  %vm1557_vm10 = vcmp.ge.s32.totalorder %v2220_v51, 2576980378 }
 0x4b9   : > { %2421 = vpow2.f32 %v1483_v29  ;;  %v993_v28 = vmul.f32 %v3301_v49, %v3035_v1  ;;  %v1061_v63 = vmul.f32 %v961_v17, %v791_v19  ;;  %v985_v62 = vsel %vm3321_vm13, %v3285_v42, %v981_v57 }
 0x4ba   : > { %1076 = vxpose.xlu0.b32.cont [9/16] (narrow) %v1060_v40, 8  ;;  %2423 = vrcp.f32 %v3042_v21  ;;  %vm998_vm15 = vweird.f32 %v3301_v49  ;;  %v1003_v42 = vand.u32 2147483648, %v3035_v1  ;;  %v2219_v1 = vld [vmem:[%s2992_s27 + $0xf0] sm:$0xff]  ;;  %vm1032_vm13 = vcmp.eq.f32.partialorder %v1031_v30, 8.507059e+37 }
 0x4bb   : > { %v994_v59 = vsub.f32 1.0, %v993_v28  ;;  %vm999_vm2 = vmor %vm997_vm1, %vm998_vm15  ;;  %vm1556_vm5 = vcmp.ge.s32.totalorder %v2219_v1, 2576980378  ;;  %vm1042_vm15 = vweird.f32 %v3044_v8 }
 0x4bc   : > { %v1438_v26 = vpop.xlane.xlu1 %1437  ;;  %v1004_v29 = vor.u32 1.1754944e-38, %v1003_v42 }
 0x4bd   : > { %v1457_v33 = vsub.f32 %v3092_v4, %v1438_v26  ;;  %v970_v4 = vsel %vm969_vm8, %v3266_v15, %v966_v13  ;;  %v988_v15 = vand.u32 2147483648, %v3095_v44  ;;  %v995_v31 = vmul.f32 %v3301_v49, %v994_v59 }
 0x4be   : > { %v975_v48 = vsel %vm972_vm9, %v974_v6, %v970_v4  ;;  %v1016_v13 = vand.u32 2147483647, %v3042_v21  ;;  %v1033_v4 = vand.u32 2147483648, %v3100_v46 }
 0x4bf   : > { %v2422_v25 = vpop.eup %2421  ;;  %v1485_v12 = vmul.f32 1.442695, %v1457_v33  ;;  %v976_v22 = vmul.f32 1.1111112, %v975_v48  ;;  %v989_v9 = vor.u32 1.1754944e-38, %v988_v15  ;;  %v996_v23 = vadd.f32 %v3301_v49, %v995_v31 }
 0x4c0   : > { %1515 = vadd.xlane.f32.xlu1 %v2422_v25  ;;  %2232 = vmatmul.msk.f32.gmra.mxu3 %vm1553_vm6, %v2422_v25  ;;  %v3315_v38 = vpop.eup %2423  ;;  %vm1012_vm6 = vweird.f32 %v3042_v21  ;;  %v1019_v25 = vor.u32 1.1754944e-38, %v1018_v37  ;;  %vm1017_vm8 = vcmp.eq.f32.partialorder %v1016_v13, 8.507059e+37 }
 0x4c1   : > { %2425 = vpow2.f32 %v1485_v12  ;;  %v1062_v20 = vmul.f32 %v976_v22, %v794_v53  ;;  %v990_v44 = vsel %vm987_vm14, %v989_v9, %v985_v62  ;;  %vm1013_vm4 = vweird.f32 %v3315_v38 }
 0x4c2   : > { %1077 = vxpose.xlu0.b32.cont [10/16] (narrow) %v1061_v63, 8  ;;  %2427 = vrcp.f32 %v3100_v46  ;;  %v991_v35 = vmul.f32 1.1111112, %v990_v44  ;;  %vm1014_vm7 = vmor %vm1012_vm6, %vm1013_vm4  ;;  %v1046_v62 = vand.u32 2147483647, %v3044_v8 }
 0x4c4   : > { %v1440_v11 = vpop.xlane.xlu0 %1439  ;;  %v1063_v0 = vmul.f32 %v991_v35, %v797_v50  ;;  %vm1047_vm1 = vcmp.eq.f32.partialorder %v1046_v62, 8.507059e+37 }
 0x4c5   : > { %v1458_v32 = vsub.f32 %v3097_v39, %v1440_v11  ;;  %v1008_v39 = vmul.f32 %v3315_v38, %v3042_v21 }
 0x4c7   : > { %v2426_v10 = vpop.eup %2425  ;;  %v1487_v5 = vmul.f32 1.442695, %v1458_v32  ;;  %v1009_v19 = vsub.f32 1.0, %v1008_v39 }
 0x4c8   : > { %1517 = vadd.xlane.f32.xlu2 %v2426_v10  ;;  %2233 = vmatmul.msk.f32.gmra.mxu3 %vm1554_vm12, %v2426_v10  ;;  %v3333_v55 = vpop.eup %2427 }
 0x4c9   : > { %2429 = vpow2.f32 %v1487_v5  ;;  %v1023_v16 = vmul.f32 %v3333_v55, %v3100_v46  ;;  %v1010_v41 = vmul.f32 %v3315_v38, %v1009_v19  ;;  %vm1028_vm9 = vweird.f32 %v3333_v55 }
 0x4ca   : > { %1078 = vxpose.xlu0.b32.cont [11/16] (narrow) %v1062_v20, 8  ;;  %2431 = vrcp.f32 %v3044_v8  ;;  %vm1029_vm12 = vmor %vm1027_vm11, %vm1028_vm9  ;;  %v1048_v46 = vand.u32 2147483648, %v3044_v8 }
 0x4cb   : > { %v1024_v34 = vsub.f32 1.0, %v1023_v16  ;;  %v1011_v45 = vadd.f32 %v3315_v38, %v1010_v41 }
 0x4cc   : > { %v1442_v18 = vpop.xlane.xlu2 %1441  ;;  %v1049_v31 = vor.u32 1.1754944e-38, %v1048_v46 }
 0x4cd   : > { %v1459_v61 = vsub.f32 %v3105_v54, %v1442_v18  ;;  %v1000_v54 = vsel %vm999_vm2, %v3301_v49, %v996_v23  ;;  %v1025_v49 = vmul.f32 %v3333_v55, %v1024_v34  ;;  %v1015_v36 = vsel %vm1014_vm7, %v3315_v38, %v1011_v45 }
 0x4ce   : > { %v1005_v40 = vsel %vm1002_vm3, %v1004_v29, %v1000_v54  ;;  %v1020_v21 = vsel %vm1017_vm8, %v1019_v25, %v1015_v36  ;;  %v1034_v38 = vor.u32 1.1754944e-38, %v1033_v4 }
 0x4cf   : > { %v2430_v27 = vpop.eup %2429  ;;  %v1489_v7 = vmul.f32 1.442695, %v1459_v61  ;;  %v1006_v53 = vmul.f32 1.1111112, %v1005_v40  ;;  %v1026_v63 = vadd.f32 %v3333_v55, %v1025_v49  ;;  %v1021_v6 = vmul.f32 1.1111112, %v1020_v21 }
 0x4d0   : > { %1519 = vadd.xlane.f32.xlu1 %v2430_v27  ;;  %2234 = vmatmul.msk.f32.gmra.mxu3 %vm1555_vm0, %v2430_v27  ;;  %v3349_v58 = vpop.eup %2431 }
 0x4d1   : > { %2433 = vpow2.f32 %v1489_v7  ;;  %v1038_v33 = vmul.f32 %v3349_v58, %v3044_v8  ;;  %v1064_v17 = vmul.f32 %v1006_v53, %v800_v14  ;;  %v1030_v11 = vsel %vm1029_vm12, %v3333_v55, %v1026_v63 }
 0x4d2   : > { %1079 = vxpose.xlu0.b32.cont [12/16] (narrow) %v1063_v0, 8  ;;  %v1035_v32 = vsel %vm1032_vm13, %v1034_v38, %v1030_v11  ;;  %vm1043_vm14 = vweird.f32 %v3349_v58 }
 0x4d3   : > { %v1039_v28 = vsub.f32 1.0, %v1038_v33  ;;  %v1036_v10 = vmul.f32 1.1111112, %v1035_v32  ;;  %vm1044_vm0 = vmor %vm1042_vm15, %vm1043_vm14 }
 0x4d4   : > { %v1444_v56 = vpop.xlane.xlu1 %1443 }
 0x4d5   : > { %v1460_v60 = vsub.f32 %v3111_v24, %v1444_v56  ;;  %v803_v24 = vpop.f32.mrf.mxu2  ;;  %v1040_v57 = vmul.f32 %v3349_v58, %v1039_v28 }
 0x4d6   : > { %v1065_v59 = vmul.f32 %v1021_v6, %v803_v24 }
 0x4d7   : > { %v2434_v26 = vpop.eup %2433  ;;  %v1491_v3 = vmul.f32 1.442695, %v1460_v60  ;;  %v1041_v2 = vadd.f32 %v3349_v58, %v1040_v57 }
 0x4d8   : > { %1521 = vadd.xlane.f32.xlu2 %v2434_v26  ;;  %2235 = vmatmul.msk.f32.gmra.mxu3 %vm1556_vm5, %v2434_v26 }
 0x4d9   : > { %2435 = vpow2.f32 %v1491_v3  ;;  %v1045_v39 = vsel %vm1044_vm0, %v3349_v58, %v1041_v2 }
 0x4da   : > { %1080 = vxpose.xlu0.b32.cont [13/16] (narrow) %v1064_v17, 8  ;;  %v1050_v47 = vsel %vm1047_vm1, %v1049_v31, %v1045_v39 }
 0x4db   : > { %v3360_v12 = vpop.xlane.xlu2 %1493  ;;  %v1051_v42 = vmul.f32 1.1111112, %v1050_v47 }
 0x4dc   : > { %2437 = vrcp.f32 %v3360_v12  ;;  %v1698_v27 = vand.u32 2147483648, %v3360_v12  ;;  %vm1692_vm3 = vweird.f32 %v3360_v12  ;;  %v1696_v16 = vand.u32 2147483647, %v3360_v12 }
 0x4dd   : > { %v806_v15 = vpop.f32.mrf.mxu2 }
 0x4de   : > { %v1066_v5 = vmul.f32 %v1036_v10, %v806_v15  ;;  %v1699_v29 = vor.u32 1.1754944e-38, %v1698_v27  ;;  %vm1697_vm5 = vcmp.eq.f32.partialorder %v1696_v16, 8.507059e+37 }
 0x4df   : > { %v2436_v48 = vpop.eup %2435 }
 0x4e0   : > { %1523 = vadd.xlane.f32.xlu1 %v2436_v48  ;;  %2236 = vmatmul.msk.f32.gmra.mxu3 %vm1557_vm10, %v2436_v48 }
 0x4e2   : > { %v2438_v50 = vpop.eup %2437  ;;  %1081 = vxpose.xlu0.b32.cont [14/16] (narrow) %v1065_v59, 8 }
 0x4e3   : > { %v1496_v22 = vpop.xlane.xlu1 %1495  ;;  %v1688_v52 = vmul.f32 %v2438_v50, %v3360_v12  ;;  %vm1693_vm2 = vweird.f32 %v2438_v50 }
 0x4e4   : > { %2439 = vrcp.f32 %v1496_v22  ;;  %vm1694_vm4 = vmor %vm1692_vm3, %vm1693_vm2  ;;  %v1713_v56 = vand.u32 2147483648, %v1496_v22  ;;  %vm1707_vm7 = vweird.f32 %v1496_v22  ;;  %v1711_v37 = vand.u32 2147483647, %v1496_v22 }
 0x4e5   : > { %v1689_v20 = vsub.f32 1.0, %v1688_v52  ;;  %v809_v19 = vpop.f32.mrf.mxu2 }
 0x4e6   : > { %v1067_v8 = vmul.f32 %v1051_v42, %v809_v19  ;;  %v1714_v3 = vor.u32 1.1754944e-38, %v1713_v56  ;;  %vm1712_vm9 = vcmp.eq.f32.partialorder %v1711_v37, 8.507059e+37 }
 0x4e7   : > { %v1690_v23 = vmul.f32 %v2438_v50, %v1689_v20 }
 0x4e9   : > { %v1691_v35 = vadd.f32 %v2438_v50, %v1690_v23 }
 0x4ea   : > { %v2440_v9 = vpop.eup %2439  ;;  %1082 = vxpose.xlu0.b32.cont [15/16] (narrow) %v1066_v5, 8 }
 0x4eb   : > { %v3377_v44 = vpop.xlane.xlu2 %1497  ;;  %v1639_v55 = vpop.f32.mrf.mxu3  ;;  %v1703_v18 = vmul.f32 %v2440_v9, %v1496_v22  ;;  %v1695_v54 = vsel %vm1694_vm4, %v2438_v50, %v1691_v35  ;;  %vm1708_vm6 = vweird.f32 %v2440_v9 }
 0x4ec   : > { %2441 = vrcp.f32 %v3377_v44  ;;  %v1700_v1 = vsel %vm1697_vm5, %v1699_v29, %v1695_v54  ;;  %vm1709_vm8 = vmor %vm1707_vm7, %vm1708_vm6  ;;  %v1728_v51 = vand.u32 2147483648, %v3377_v44  ;;  %vm1722_vm11 = vweird.f32 %v3377_v44 }
 0x4ed   : > { %v1704_v61 = vsub.f32 1.0, %v1703_v18  ;;  %v1701_v58 = vmul.f32 1.1111112, %v1700_v1  ;;  %v1726_v12 = vand.u32 2147483647, %v3377_v44 }
 0x4ee   : > { %v1729_v48 = vor.u32 1.1754944e-38, %v1728_v51 }
 0x4ef   : > { %v1705_v41 = vmul.f32 %v2440_v9, %v1704_v61  ;;  %v1927_v33 = vmul.f32 %v1701_v58, %v1639_v55  ;;  %vm1727_vm13 = vcmp.eq.f32.partialorder %v1726_v12, 8.507059e+37 }
 0x4f1   : > { %v1706_v40 = vadd.f32 %v2440_v9, %v1705_v41 }
 0x4f2   : > { %v2442_v43 = vpop.eup %2441  ;;  %1083 = vxpose.xlu0.b32.end [16/16] (narrow) %v1067_v8, 8 }
 0x4f3   : > { %v3383_v14 = vpop.xlane.xlu1 %1499  ;;  %v1642_v7 = vpop.f32.mrf.mxu3  ;;  %v1718_v0 = vmul.f32 %v2442_v43, %v3377_v44  ;;  %v1710_v49 = vsel %vm1709_vm8, %v2440_v9, %v1706_v40  ;;  %vm1723_vm10 = vweird.f32 %v2442_v43 }
 0x4f4   : > { %2443 = vrcp.f32 %v3383_v14  ;;  %v1715_v17 = vsel %vm1712_vm9, %v1714_v3, %v1710_v49  ;;  %vm1724_vm12 = vmor %vm1722_vm11, %vm1723_vm10  ;;  %v1743_v15 = vand.u32 2147483648, %v3383_v14  ;;  %vm1737_vm15 = vweird.f32 %v3383_v14 }
 0x4f5   : > { %v1719_v34 = vsub.f32 1.0, %v1718_v0  ;;  %v1716_v21 = vmul.f32 1.1111112, %v1715_v17  ;;  %v1741_v22 = vand.u32 2147483647, %v3383_v14 }
 0x4f6   : > { %v1744_v5 = vor.u32 1.1754944e-38, %v1743_v15 }
 0x4f7   : > { %v1720_v13 = vmul.f32 %v2442_v43, %v1719_v34  ;;  %v1928_v57 = vmul.f32 %v1716_v21, %v1642_v7  ;;  %vm1742_vm1 = vcmp.eq.f32.partialorder %v1741_v22, 8.507059e+37 }
 0x4f9   : > { %v1721_v24 = vadd.f32 %v2442_v43, %v1720_v13 }
 0x4fa   : > { %v2444_v45 = vpop.eup %2443 }
 0x4fb   : > { %v3387_v60 = vpop.xlane.xlu2 %1501  ;;  %v1645_v53 = vpop.f32.mrf.mxu3  ;;  %v1733_v26 = vmul.f32 %v2444_v45, %v3383_v14  ;;  %v1725_v30 = vsel %vm1724_vm12, %v2442_v43, %v1721_v24  ;;  %vm1738_vm14 = vweird.f32 %v2444_v45 }
 0x4fc   : > { %2445 = vrcp.f32 %v3387_v60  ;;  %v1730_v59 = vsel %vm1727_vm13, %v1729_v48, %v1725_v30  ;;  %vm1739_vm0 = vmor %vm1737_vm15, %vm1738_vm14  ;;  %v1758_v44 = vand.u32 2147483648, %v3387_v60  ;;  %vm1752_vm3 = vweird.f32 %v3387_v60 }
 0x4fd   : > { %v1734_v36 = vsub.f32 1.0, %v1733_v26  ;;  %v1731_v32 = vmul.f32 1.1111112, %v1730_v59  ;;  %v1756_v19 = vand.u32 2147483647, %v3387_v60 }
 0x4fe   : > { %v1759_v35 = vor.u32 1.1754944e-38, %v1758_v44 }
 0x4ff   : > { %v1735_v4 = vmul.f32 %v2444_v45, %v1734_v36  ;;  %v1929_v39 = vmul.f32 %v1731_v32, %v1645_v53  ;;  %vm1757_vm5 = vcmp.eq.f32.partialorder %v1756_v19, 8.507059e+37 }
 0x501   : > { %1943 = vxpose.xlu2.b32.start [1/16] (narrow) %v1927_v33, 8  ;;  %v1736_v38 = vadd.f32 %v2444_v45, %v1735_v4 }
 0x502   : > { %v2446_v25 = vpop.eup %2445 }
 0x503   : > { %v3394_v28 = vpop.xlane.xlu1 %1503  ;;  %v1648_v63 = vpop.f32.mrf.mxu3  ;;  %v1748_v6 = vmul.f32 %v2446_v25, %v3387_v60  ;;  %v1740_v62 = vsel %vm1739_vm0, %v2444_v45, %v1736_v38  ;;  %vm1753_vm2 = vweird.f32 %v2446_v25 }
 0x504   : > { %2447 = vrcp.f32 %v3394_v28  ;;  %v1745_v31 = vsel %vm1742_vm1, %v1744_v5, %v1740_v62  ;;  %vm1754_vm4 = vmor %vm1752_vm3, %vm1753_vm2  ;;  %v1773_v41 = vand.u32 2147483648, %v3394_v28  ;;  %vm1767_vm7 = vweird.f32 %v3394_v28 }
 0x505   : > { %v1749_v11 = vsub.f32 1.0, %v1748_v6  ;;  %v1746_v55 = vmul.f32 1.1111112, %v1745_v31  ;;  %v1771_v54 = vand.u32 2147483647, %v3394_v28 }
 0x506   : > { %v1774_v56 = vor.u32 1.1754944e-38, %v1773_v41 }
 0x507   : > { %v1750_v52 = vmul.f32 %v2446_v25, %v1749_v11  ;;  %v1930_v43 = vmul.f32 %v1746_v55, %v1648_v63  ;;  %vm1772_vm9 = vcmp.eq.f32.partialorder %v1771_v54, 8.507059e+37 }
 0x509   : > { %1944 = vxpose.xlu2.b32.cont [2/16] (narrow) %v1928_v57, 8  ;;  %v1751_v9 = vadd.f32 %v2446_v25, %v1750_v52 }
 0x50a   : > { %v2448_v50 = vpop.eup %2447 }
 0x50b   : > { %v3401_v2 = vpop.xlane.xlu2 %1505  ;;  %v1651_v46 = vpop.f32.mrf.mxu3  ;;  %v1763_v10 = vmul.f32 %v2448_v50, %v3394_v28  ;;  %v1755_v61 = vsel %vm1754_vm4, %v2446_v25, %v1751_v9  ;;  %vm1768_vm6 = vweird.f32 %v2448_v50 }
 0x50c   : > { %2449 = vrcp.f32 %v3401_v2  ;;  %v1760_v27 = vsel %vm1757_vm5, %v1759_v35, %v1755_v61  ;;  %vm1769_vm8 = vmor %vm1767_vm7, %vm1768_vm6  ;;  %v1788_v26 = vand.u32 2147483648, %v3401_v2  ;;  %vm1782_vm11 = vweird.f32 %v3401_v2 }
 0x50d   : > { %v1764_v20 = vsub.f32 1.0, %v1763_v10  ;;  %v1761_v0 = vmul.f32 1.1111112, %v1760_v27  ;;  %v1786_v3 = vand.u32 2147483647, %v3401_v2 }
 0x50e   : > { %v1789_v25 = vor.u32 1.1754944e-38, %v1788_v26 }
 0x50f   : > { %v1765_v42 = vmul.f32 %v2448_v50, %v1764_v20  ;;  %v1931_v58 = vmul.f32 %v1761_v0, %v1651_v46  ;;  %vm1787_vm13 = vcmp.eq.f32.partialorder %v1786_v3, 8.507059e+37 }
 0x511   : > { %1945 = vxpose.xlu2.b32.cont [3/16] (narrow) %v1929_v39, 8  ;;  %v1766_v14 = vadd.f32 %v2448_v50, %v1765_v42 }
 0x512   : > { %v2450_v47 = vpop.eup %2449 }
 0x513   : > { %v3408_v23 = vpop.xlane.xlu1 %1507  ;;  %v1654_v18 = vpop.f32.mrf.mxu3  ;;  %v1778_v8 = vmul.f32 %v2450_v47, %v3401_v2  ;;  %v1770_v45 = vsel %vm1769_vm8, %v2448_v50, %v1766_v14  ;;  %vm1783_vm10 = vweird.f32 %v2450_v47 }
 0x514   : > { %2451 = vrcp.f32 %v3408_v23  ;;  %v1775_v37 = vsel %vm1772_vm9, %v1774_v56, %v1770_v45  ;;  %vm1784_vm12 = vmor %vm1782_vm11, %vm1783_vm10  ;;  %v1803_v6 = vand.u32 2147483648, %v3408_v23  ;;  %vm1797_vm15 = vweird.f32 %v3408_v23 }
 0x515   : > { %v1779_v16 = vsub.f32 1.0, %v1778_v8  ;;  %v1776_v49 = vmul.f32 1.1111112, %v1775_v37  ;;  %v1801_v48 = vand.u32 2147483647, %v3408_v23 }
 0x516   : > { %v1804_v50 = vor.u32 1.1754944e-38, %v1803_v6 }
 0x517   : > { %v1780_v34 = vmul.f32 %v2450_v47, %v1779_v16  ;;  %v1932_v21 = vmul.f32 %v1776_v49, %v1654_v18  ;;  %vm1802_vm1 = vcmp.eq.f32.partialorder %v1801_v48, 8.507059e+37 }
 0x519   : > { %1946 = vxpose.xlu2.b32.cont [4/16] (narrow) %v1930_v43, 8  ;;  %v1781_v53 = vadd.f32 %v2450_v47, %v1780_v34 }
 0x51a   : > { %v2452_v7 = vpop.eup %2451 }
 0x51b   : > { %v3415_v29 = vpop.xlane.xlu2 %1509  ;;  %v1657_v1 = vpop.f32.mrf.mxu3  ;;  %v1793_v40 = vmul.f32 %v2452_v7, %v3408_v23  ;;  %v1785_v24 = vsel %vm1784_vm12, %v2450_v47, %v1781_v53  ;;  %vm1798_vm14 = vweird.f32 %v2452_v7 }
 0x51c   : > { %2453 = vrcp.f32 %v3415_v29  ;;  %v1790_v12 = vsel %vm1787_vm13, %v1789_v25, %v1785_v24  ;;  %vm1799_vm0 = vmor %vm1797_vm15, %vm1798_vm14  ;;  %v1818_v10 = vand.u32 2147483648, %v3415_v29  ;;  %vm1812_vm3 = vweird.f32 %v3415_v29 }
 0x51d   : > { %v1794_v60 = vsub.f32 1.0, %v1793_v40  ;;  %v1791_v30 = vmul.f32 1.1111112, %v1790_v12  ;;  %v1816_v5 = vand.u32 2147483647, %v3415_v29 }
 0x51e   : > { %v1819_v47 = vor.u32 1.1754944e-38, %v1818_v10 }
 0x51f   : > { %v1795_v17 = vmul.f32 %v2452_v7, %v1794_v60  ;;  %v1933_v15 = vmul.f32 %v1791_v30, %v1657_v1  ;;  %vm1817_vm5 = vcmp.eq.f32.partialorder %v1816_v5, 8.507059e+37 }
 0x521   : > { %1947 = vxpose.xlu2.b32.cont [5/16] (narrow) %v1931_v58, 8  ;;  %v1796_v63 = vadd.f32 %v2452_v7, %v1795_v17 }
 0x522   : > { %v2454_v13 = vpop.eup %2453 }
 0x523   : > { %v3422_v33 = vpop.xlane.xlu1 %1511  ;;  %v1808_v36 = vmul.f32 %v2454_v13, %v3415_v29  ;;  %v1660_v51 = vpop.f32.mrf.mxu3  ;;  %v1800_v38 = vsel %vm1799_vm0, %v2452_v7, %v1796_v63  ;;  %vm1813_vm2 = vweird.f32 %v2454_v13 }
 0x524   : > { %2455 = vrcp.f32 %v3422_v33  ;;  %v1805_v32 = vsel %vm1802_vm1, %v1804_v50, %v1800_v38  ;;  %vm1814_vm4 = vmor %vm1812_vm3, %vm1813_vm2  ;;  %v1833_v8 = vand.u32 2147483648, %v3422_v33  ;;  %vm1827_vm7 = vweird.f32 %v3422_v33 }
 0x525   : > { %v1809_v28 = vsub.f32 1.0, %v1808_v36  ;;  %v1806_v62 = vmul.f32 1.1111112, %v1805_v32  ;;  %v1831_v35 = vand.u32 2147483647, %v3422_v33 }
 0x526   : > { %v1834_v7 = vor.u32 1.1754944e-38, %v1833_v8 }
 0x527   : > { %v1810_v59 = vmul.f32 %v2454_v13, %v1809_v28  ;;  %v1934_v44 = vmul.f32 %v1806_v62, %v1660_v51  ;;  %vm1832_vm9 = vcmp.eq.f32.partialorder %v1831_v35, 8.507059e+37 }
 0x529   : > { %1948 = vxpose.xlu2.b32.cont [6/16] (narrow) %v1932_v21, 8  ;;  %v1811_v46 = vadd.f32 %v2454_v13, %v1810_v59 }
 0x52a   : > { %v2456_v4 = vpop.eup %2455 }
 0x52b   : > { %v3429_v57 = vpop.xlane.xlu2 %1513  ;;  %v1823_v11 = vmul.f32 %v2456_v4, %v3422_v33  ;;  %v1663_v22 = vpop.f32.mrf.mxu3  ;;  %v1815_v9 = vsel %vm1814_vm4, %v2454_v13, %v1811_v46  ;;  %vm1828_vm6 = vweird.f32 %v2456_v4 }
 0x52c   : > { %2457 = vrcp.f32 %v3429_v57  ;;  %v1820_v55 = vsel %vm1817_vm5, %v1819_v47, %v1815_v9  ;;  %vm1829_vm8 = vmor %vm1827_vm7, %vm1828_vm6  ;;  %v1848_v34 = vand.u32 2147483648, %v3429_v57  ;;  %vm1842_vm11 = vweird.f32 %v3429_v57 }
 0x52d   : > { %v1824_v2 = vsub.f32 1.0, %v1823_v11  ;;  %v1821_v61 = vmul.f32 1.1111112, %v1820_v55  ;;  %v1846_v45 = vand.u32 2147483647, %v3429_v57 }
 0x52e   : > { %v1849_v13 = vor.u32 1.1754944e-38, %v1848_v34 }
 0x52f   : > { %v1825_v31 = vmul.f32 %v2456_v4, %v1824_v2  ;;  %v1935_v41 = vmul.f32 %v1821_v61, %v1663_v22  ;;  %vm1847_vm13 = vcmp.eq.f32.partialorder %v1846_v45, 8.507059e+37 }
 0x531   : > { %1949 = vxpose.xlu2.b32.cont [7/16] (narrow) %v1933_v15, 8  ;;  %v1826_v23 = vadd.f32 %v2456_v4, %v1825_v31  ;;  %v1084_v31 = vpop.trf.xlu0 }
 0x532   : > { %v2458_v52 = vpop.eup %2457  ;;  %1100 = vst [vmem:[%s3469_s4] sm:$0x7] %v1084_v31 }
 0x533   : > { %v3436_v39 = vpop.xlane.xlu1 %1515  ;;  %v1838_v20 = vmul.f32 %v2458_v52, %v3429_v57  ;;  %v1666_v42 = vpop.f32.mrf.mxu3  ;;  %v1830_v14 = vsel %vm1829_vm8, %v2456_v4, %v1826_v23  ;;  %vm1843_vm10 = vweird.f32 %v2458_v52 }
 0x534   : > { %2459 = vrcp.f32 %v3436_v39  ;;  %v1835_v0 = vsel %vm1832_vm9, %v1834_v7, %v1830_v14  ;;  %vm1844_vm12 = vmor %vm1842_vm11, %vm1843_vm10  ;;  %v1863_v36 = vand.u32 2147483648, %v3436_v39  ;;  %vm1857_vm15 = vweird.f32 %v3436_v39 }
 0x535   : > { %v1839_v19 = vsub.f32 1.0, %v1838_v20  ;;  %v1836_v40 = vmul.f32 1.1111112, %v1835_v0  ;;  %v1861_v25 = vand.u32 2147483647, %v3436_v39 }
 0x536   : > { %v1864_v4 = vor.u32 1.1754944e-38, %v1863_v36 }
 0x537   : > { %v1840_v27 = vmul.f32 %v2458_v52, %v1839_v19  ;;  %v1936_v26 = vmul.f32 %v1836_v40, %v1666_v42  ;;  %vm1862_vm1 = vcmp.eq.f32.partialorder %v1861_v25, 8.507059e+37 }
 0x539   : > { %1950 = vxpose.xlu2.b32.cont [8/16] (narrow) %v1934_v44, 8  ;;  %v1841_v29 = vadd.f32 %v2458_v52, %v1840_v27 }
 0x53a   : > { %v2460_v18 = vpop.eup %2459 }
 0x53b   : > { %v3443_v43 = vpop.xlane.xlu2 %1517  ;;  %v1853_v16 = vmul.f32 %v2460_v18, %v3436_v39  ;;  %v1669_v58 = vpop.f32.mrf.mxu3  ;;  %v1845_v53 = vsel %vm1844_vm12, %v2458_v52, %v1841_v29  ;;  %vm1858_vm14 = vweird.f32 %v2460_v18 }
 0x53c   : > { %2461 = vrcp.f32 %v3443_v43  ;;  %v1850_v49 = vsel %vm1847_vm13, %v1849_v13, %v1845_v53  ;;  %vm1859_vm0 = vmor %vm1857_vm15, %vm1858_vm14  ;;  %v1878_v11 = vand.u32 2147483648, %v3443_v43  ;;  %vm1872_vm3 = vweird.f32 %v3443_v43 }
 0x53d   : > { %v1854_v54 = vsub.f32 1.0, %v1853_v16  ;;  %v1851_v24 = vmul.f32 1.1111112, %v1850_v49  ;;  %v1876_v50 = vand.u32 2147483647, %v3443_v43 }
 0x53e   : > { %v1879_v46 = vor.u32 1.1754944e-38, %v1878_v11 }
 0x53f   : > { %v1855_v37 = vmul.f32 %v2460_v18, %v1854_v54  ;;  %v1937_v6 = vmul.f32 %v1851_v24, %v1669_v58  ;;  %vm1877_vm5 = vcmp.eq.f32.partialorder %v1876_v50, 8.507059e+37 }
 0x541   : > { %1951 = vxpose.xlu2.b32.cont [9/16] (narrow) %v1935_v41, 8  ;;  %v1856_v33 = vadd.f32 %v2460_v18, %v1855_v37 }
 0x542   : > { %v2462_v1 = vpop.eup %2461 }
 0x543   : > { %v3450_v56 = vpop.xlane.xlu1 %1519  ;;  %v1868_v60 = vmul.f32 %v2462_v1, %v3443_v43  ;;  %v1860_v28 = vsel %vm1859_vm0, %v2460_v18, %v1856_v33  ;;  %v1672_v63 = vpop.f32.mrf.mxu3  ;;  %vm1873_vm2 = vweird.f32 %v2462_v1 }
 0x544   : > { %2463 = vrcp.f32 %v3450_v56  ;;  %v1865_v30 = vsel %vm1862_vm1, %v1864_v4, %v1860_v28  ;;  %vm1874_vm4 = vmor %vm1872_vm3, %vm1873_vm2  ;;  %v1893_v9 = vand.u32 2147483648, %v3450_v56  ;;  %vm1887_vm7 = vweird.f32 %v3450_v56 }
 0x545   : > { %v1869_v3 = vsub.f32 1.0, %v1868_v60  ;;  %v1866_v38 = vmul.f32 1.1111112, %v1865_v30  ;;  %v1891_v44 = vand.u32 2147483647, %v3450_v56 }
 0x546   : > { %v1894_v18 = vor.u32 1.1754944e-38, %v1893_v9 }
 0x547   : > { %v1870_v21 = vmul.f32 %v2462_v1, %v1869_v3  ;;  %v1938_v52 = vmul.f32 %v1866_v38, %v1672_v63  ;;  %vm1892_vm9 = vcmp.eq.f32.partialorder %v1891_v44, 8.507059e+37 }
 0x549   : > { %1952 = vxpose.xlu2.b32.cont [10/16] (narrow) %v1936_v26, 8  ;;  %v1871_v57 = vadd.f32 %v2462_v1, %v1870_v21 }
 0x54a   : > { %v2464_v17 = vpop.eup %2463 }
 0x54b   : > { %v3457_v51 = vpop.xlane.xlu2 %1521  ;;  %v1883_v12 = vmul.f32 %v2464_v17, %v3450_v56  ;;  %v1875_v2 = vsel %vm1874_vm4, %v2462_v1, %v1871_v57  ;;  %v1675_v10 = vpop.f32.mrf.mxu3  ;;  %vm1888_vm6 = vweird.f32 %v2464_v17 }
 0x54c   : > { %2465 = vrcp.f32 %v3457_v51  ;;  %v1880_v62 = vsel %vm1877_vm5, %v1879_v46, %v1875_v2  ;;  %vm1889_vm8 = vmor %vm1887_vm7, %vm1888_vm6  ;;  %v1908_v27 = vand.u32 2147483648, %v3457_v51  ;;  %vm1902_vm11 = vweird.f32 %v3457_v51 }
 0x54d   : > { %v1884_v48 = vsub.f32 1.0, %v1883_v12  ;;  %v1881_v47 = vmul.f32 1.1111112, %v1880_v62  ;;  %v1906_v14 = vand.u32 2147483647, %v3457_v51 }
 0x54e   : > { %v1909_v0 = vor.u32 1.1754944e-38, %v1908_v27 }
 0x54f   : > { %v1885_v32 = vmul.f32 %v2464_v17, %v1884_v48  ;;  %v1939_v42 = vmul.f32 %v1881_v47, %v1675_v10  ;;  %vm1907_vm13 = vcmp.eq.f32.partialorder %v1906_v14, 8.507059e+37 }
 0x551   : > { %1953 = vxpose.xlu2.b32.cont [11/16] (narrow) %v1937_v6, 8  ;;  %v1886_v39 = vadd.f32 %v2464_v17, %v1885_v32 }
 0x552   : > { %v2466_v59 = vpop.eup %2465 }
 0x553   : > { %v1524_v15 = vpop.xlane.xlu1 %1523  ;;  %v1898_v22 = vmul.f32 %v2466_v59, %v3457_v51  ;;  %v1890_v23 = vsel %vm1889_vm8, %v2464_v17, %v1886_v39  ;;  %vm1903_vm10 = vweird.f32 %v2466_v59  ;;  %v1678_v43 = vpop.f32.mrf.mxu3 }
 0x554   : > { %2467 = vrcp.f32 %v1524_v15  ;;  %v1895_v8 = vsel %vm1892_vm9, %v1894_v18, %v1890_v23  ;;  %vm1904_vm12 = vmor %vm1902_vm11, %vm1903_vm10  ;;  %v1923_v34 = vand.u32 2147483648, %v1524_v15  ;;  %vm1917_vm15 = vweird.f32 %v1524_v15 }
 0x555   : > { %v1899_v5 = vsub.f32 1.0, %v1898_v22  ;;  %v1896_v16 = vmul.f32 1.1111112, %v1895_v8  ;;  %v1921_v45 = vand.u32 2147483647, %v1524_v15 }
 0x556   : > { %v1924_v37 = vor.u32 1.1754944e-38, %v1923_v34 }
 0x557   : > { %v1900_v55 = vmul.f32 %v2466_v59, %v1899_v5  ;;  %v1940_v54 = vmul.f32 %v1896_v16, %v1678_v43  ;;  %vm1922_vm1 = vcmp.eq.f32.partialorder %v1921_v45, 8.507059e+37 }
 0x559   : > { %1954 = vxpose.xlu2.b32.cont [12/16] (narrow) %v1938_v52, 8  ;;  %v1901_v35 = vadd.f32 %v2466_v59, %v1900_v55 }
 0x55a   : > { %v2468_v20 = vpop.eup %2467 }
 0x55b   : > { %v1913_v19 = vmul.f32 %v2468_v20, %v1524_v15  ;;  %v1905_v41 = vsel %vm1904_vm12, %v2466_v59, %v1901_v35  ;;  %vm1918_vm14 = vweird.f32 %v2468_v20  ;;  %v1681_v56 = vpop.f32.mrf.mxu3 }
 0x55c   : > { %v1910_v29 = vsel %vm1907_vm13, %v1909_v0, %v1905_v41  ;;  %vm1919_vm0 = vmor %vm1917_vm15, %vm1918_vm14 }
 0x55d   : > { %v1914_v61 = vsub.f32 1.0, %v1913_v19  ;;  %v1911_v40 = vmul.f32 1.1111112, %v1910_v29 }
 0x55f   : > { %v1915_v7 = vmul.f32 %v2468_v20, %v1914_v61  ;;  %v1941_v60 = vmul.f32 %v1911_v40, %v1681_v56 }
 0x561   : > { %1955 = vxpose.xlu2.b32.cont [13/16] (narrow) %v1939_v42, 8  ;;  %v1916_v1 = vadd.f32 %v2468_v20, %v1915_v7 }
 0x563   : > { %v1920_v58 = vsel %vm1919_vm0, %v2468_v20, %v1916_v1  ;;  %v1684_v26 = vpop.f32.mrf.mxu3 }
 0x564   : > { %v1925_v53 = vsel %vm1922_vm1, %v1924_v37, %v1920_v58 }
 0x565   : > { %v1926_v13 = vmul.f32 1.1111112, %v1925_v53 }
 0x567   : > { %v1942_v49 = vmul.f32 %v1926_v13, %v1684_v26 }
 0x569   : > { %1956 = vxpose.xlu2.b32.cont [14/16] (narrow) %v1940_v54, 8 }
 0x571   : > { %1957 = vxpose.xlu2.b32.cont [15/16] (narrow) %v1941_v60, 8 }
 0x579   : > { %1958 = vxpose.xlu2.b32.end [16/16] (narrow) %v1942_v49, 8 }
 0x59a   : > { %v1959_v3 = vpop.trf.xlu2 }
 0x59b   : > { %2237 = vst [vmem:[%s3469_s4 + $0x4] sm:$0x7] %v1959_v3 }
 0x59c PF: > { %s13_s12 = sadd.s32 1, %s2475_s12  }
 0x59d   : > { %p10_p4 = scmp.ge.s32.totalorder %s13_s12, 4  }
 0x59f   :  { %12 = sbr.rel (!%p10_p4) target bundleno = 1 (0x1), region = 72 }

</bundles_post_ra>
